<compile_context>
chip_gen: v7x
topology: tpu7x:2x2x1
jax: 0.10.0
libtpu: 0.0.40
codegen_flags: <defaults>
</compile_context>

<pallas_src>
import functools

import jax
import jax.numpy as jnp
from jax.experimental import pallas as pl
from jax.experimental.pallas import tpu as pltpu


# ----------------------------- Pallas kernel --------------------------------

def _birnn_gru_tag_kernel(num_layers, hidden, seq_len, batch_tile, unroll,
                          x_ref, *refs):
    """Fused bidirectional multi-layer GRU + hidden2tag for one batch tile.

    Layout conventions (all 2D; rows are time-major within the tile,
    row = t * batch_tile + b):
      per layer (wrapper-built fused weights):
        W_ih_all (D_in, 6H) bf16, columns gate-major [r_f r_b z_f z_b n_f n_b]
        W_hh_blk (2H, 6H)  f32, block-diagonal over directions, same column order
        b_x      (1, 6H)   b_ih (+ b_hh folded for r/z gates)
        b_hn     (1, 6H)   zeros except b_hh of the n gate
      W_tag (2H, Tpad) bf16, b_tag (1, Tpad) f32 (lane-dense, Tpad multiple of 128)
      hidden state carried as (Bt, 2H) = [h_fwd | h_bwd] lanes
      the backward stream is stored TIME-REVERSED in the scratch slabs so both
      directions read/write row t at loop step t.
    """
    H = hidden
    S = seq_len
    Bt = batch_tile
    f32 = jnp.float32
    bf16 = jnp.bfloat16

    n_w = 4 * num_layers
    w_refs = refs[:n_w]
    wtag_ref = refs[n_w]
    btag_ref = refs[n_w + 1]
    out_ref = refs[n_w + 2]
    xp_rz_scr, xp_n_scr, act_scr, cat_scr = refs[n_w + 3:]

    def rev_time(a):
        # Reverse the time axis of an (S*Bt, W) slab via static slices + one
        # concat (amortized once per layer; off the serial critical path).
        if S <= 1:
            return a
        parts = [a[(S - 1 - t) * Bt:(S - t) * Bt, :] for t in range(S)]
        return jnp.concatenate(parts, axis=0)

    for layer in range(num_layers):
        wih_ref, whh_ref, bx_ref, bhn_ref = w_refs[4 * layer: 4 * layer + 4]

        # ---- hoisted input projection: ONE (R, D_in) @ (D_in, 6H) bf16 matmul
        #      covering both directions, all gates and all timesteps.
        if layer == 0:
            xin = x_ref[...]                                  # already bf16
        else:
            xin = cat_scr[...].astype(bf16)
        xp = jnp.dot(xin, wih_ref[...],
                     preferred_element_type=f32) + bx_ref[...]        # (R, 6H)

        # split gate-major columns; time-reverse the bwd stream (once / layer)
        rf, rb = xp[:, 0:H], rev_time(xp[:, H:2 * H])
        zf, zb = xp[:, 2 * H:3 * H], rev_time(xp[:, 3 * H:4 * H])
        nf, nb = xp[:, 4 * H:5 * H], rev_time(xp[:, 5 * H:6 * H])
        xp_rz_scr[...] = jnp.concatenate([rf, rb, zf, zb], axis=-1)   # (R, 4H)
        xp_n_scr[...] = jnp.concatenate([nf, nb], axis=-1)            # (R, 2H)

        # ---- serial recurrence: one fused (Bt,2H)x(2H,6H) matmul per step.
        whh_v = whh_ref[...]                                     # hoisted weights
        bhn_bc = jnp.broadcast_to(bhn_ref[...], (Bt, 6 * H))     # hoisted broadcast
        h0 = jnp.zeros((Bt, 2 * H), f32)

        def step(t, h):
            row = pl.ds(t * Bt, Bt)
            x_rz = xp_rz_scr[row, :]                             # (Bt, 4H)
            x_n = xp_n_scr[row, :]                               # (Bt, 2H)
            hp = jnp.dot(h, whh_v, preferred_element_type=f32) + bhn_bc
            rz = jax.nn.sigmoid(x_rz + hp[:, 0:4 * H])           # one EUP push
            r = rz[:, 0:2 * H]
            z = rz[:, 2 * H:4 * H]
            n = jnp.tanh(x_n + r * hp[:, 4 * H:6 * H])           # PyTorch GRU n-gate
            h_new = z * (h - n) + n                              # == (1-z)*n + z*h
            act_scr[row, :] = h_new                              # single contiguous store
            return h_new

        jax.lax.fori_loop(0, S, step, h0, unroll=unroll)
        # TODO(synk): nn.GRU inter-layer dropout skipped (eval-mode / deterministic forward).

        # ---- un-reverse the bwd half once -> real concat(fwd, bwd) layout
        hf = act_scr[:, 0:H]
        hb = rev_time(act_scr[:, H:2 * H])
        cat_scr[...] = jnp.concatenate([hf, hb], axis=-1)

    # ---- hidden2tag epilogue, lane-dense output (tag dim padded to 128).
    logits = jnp.dot(cat_scr[...].astype(bf16), wtag_ref[...],
                     preferred_element_type=f32) + btag_ref[...]
    out_ref[...] = logits


# ----------------------------- Pallas wrapper --------------------------------

def _fuse_gru_layer(layer_params, H):
    """Build fused gate-major / block-diagonal weights for one GRU layer."""
    (wih_f, whh_f, bih_f, bhh_f), (wih_b, whh_b, bih_b, bhh_b) = layer_params

    def g(w):  # split (.., 3H) into per-gate (.., H) chunks (r, z, n)
        return [w[..., k * H:(k + 1) * H] for k in range(3)]

    ir_f, iz_f, in_f = g(wih_f)
    ir_b, iz_b, in_b = g(wih_b)
    wih_all = jnp.concatenate([ir_f, ir_b, iz_f, iz_b, in_f, in_b],
                              axis=1).astype(jnp.bfloat16)         # (D_in, 6H)

    hr_f, hz_f, hn_f = g(whh_f)
    hr_b, hz_b, hn_b = g(whh_b)
    zero = jnp.zeros((H, H), jnp.float32)
    whh_blk = jnp.concatenate([
        jnp.concatenate([hr_f, zero, hz_f, zero, hn_f, zero], axis=1),
        jnp.concatenate([zero, hr_b, zero, hz_b, zero, hn_b], axis=1)],
        axis=0)                                                     # (2H, 6H)

    bir_f, biz_f, bin_f = g(bih_f)
    bir_b, biz_b, bin_b = g(bih_b)
    bhr_f, bhz_f, bhn_f = g(bhh_f)
    bhr_b, bhz_b, bhn_b = g(bhh_b)
    b_x = jnp.concatenate([bir_f + bhr_f, bir_b + bhr_b,
                           biz_f + bhz_f, biz_b + bhz_b,
                           bin_f, bin_b], axis=1)                   # (1, 6H)
    b_hn = jnp.concatenate([jnp.zeros((1, 4 * H), jnp.float32),
                            bhn_f, bhn_b], axis=1)                  # (1, 6H)
    return wih_all, whh_blk, b_x, b_hn


def birnn_gru_tag(x_bse, gru_params, w_tag, b_tag):
    """x_bse: (B, S, E) f32 batch-major input.  Returns logits (B, S, tagset)."""
    B, S, E = x_bse.shape
    num_layers = len(gru_params)
    H = gru_params[0][0][1].shape[0]           # W_hh: (H, 3H) -> per-direction hidden
    tagset = w_tag.shape[1]
    t_pad = ((tagset + 127) // 128) * 128      # lane-dense output width

    # v7x has 2 TensorCores: split batch into 2 parallel tiles when big enough
    # (single tile otherwise so the recurrence stays vectorized over batch).
    num_tiles = 2 if (B >= 8 and B % 2 == 0 and ((B // 2) * S) % 8 == 0) else 1
    Bt = B // num_tiles
    R = S * Bt

    # Batch-tiled, time-major-within-tile, bf16 input slab (row = t*Bt + b).
    # All layout plumbing is wrapper-side so the kernel never reshapes.
    x_tiles = (x_bse.reshape(num_tiles, Bt, S, E)
               .transpose(0, 2, 1, 3)
               .reshape(num_tiles * R, E)
               .astype(jnp.bfloat16))

    flat = []
    for layer_p in gru_params:
        flat.extend(_fuse_gru_layer(layer_p, H))

    wtag_pad = jnp.zeros((2 * H, t_pad), jnp.float32).at[:, :tagset].set(w_tag)
    wtag_pad = wtag_pad.astype(jnp.bfloat16)
    btag_pad = jnp.zeros((1, t_pad), jnp.float32).at[0, :tagset].set(b_tag)

    unroll = True if S <= 16 else 4            # guard full unroll for long sequences
    kernel = functools.partial(_birnn_gru_tag_kernel,
                               num_layers, H, S, Bt, unroll)

    full2d = lambda i: (0, 0)
    in_specs = [pl.BlockSpec((R, E), lambda i: (i, 0))]
    for w in flat:
        in_specs.append(pl.BlockSpec(w.shape, full2d))
    in_specs.append(pl.BlockSpec(wtag_pad.shape, full2d))
    in_specs.append(pl.BlockSpec(btag_pad.shape, full2d))

    out = pl.pallas_call(
        kernel,
        out_shape=jax.ShapeDtypeStruct((num_tiles * R, t_pad), jnp.float32),
        grid=(num_tiles,),
        in_specs=in_specs,
        out_specs=pl.BlockSpec((R, t_pad), lambda i: (i, 0)),
        scratch_shapes=[
            pltpu.VMEM((R, 4 * H), jnp.float32),   # x-projection: r|z gates (bwd time-reversed)
            pltpu.VMEM((R, 2 * H), jnp.float32),   # x-projection: n gate   (bwd time-reversed)
            pltpu.VMEM((R, 2 * H), jnp.float32),   # loop activations       (bwd time-reversed)
            pltpu.VMEM((R, 2 * H), jnp.float32),   # concat(fwd, bwd) activations
        ],
        compiler_params=pltpu.CompilerParams(
            dimension_semantics=("parallel",),
            vmem_limit_bytes=32 * 1024 * 1024),
    )(x_tiles, *flat, wtag_pad, btag_pad)

    logits = (out.reshape(num_tiles, S, Bt, t_pad)
              .transpose(0, 2, 1, 3)
              .reshape(B, S, t_pad))[..., :tagset]
    return logits


# ----------------------------- CRF (plain-JAX glue) -------------------------
# Tag dimension is tiny (5), so the CRF recursion stays in plain JAX.

def _logsumexp(x, axis):
    m = jnp.max(x, axis=axis)
    return m + jnp.log(jnp.sum(jnp.exp(x - jnp.expand_dims(m, axis)), axis=axis))


def crf_log_likelihood(emissions, tags, crf_params):
    """pytorch-crf semantics with mask=None, reduction='sum' (batch_first)."""
    start, end, trans = crf_params
    batch, seq_len, _ = emissions.shape

    # numerator: score of the given tag path
    first_tags = tags[:, 0]
    score = start[first_tags] + jnp.take_along_axis(
        emissions[:, 0], first_tags[:, None], axis=1)[:, 0]

    def num_step(t, s):
        prev = tags[:, t - 1]
        cur = tags[:, t]
        emit = jnp.take_along_axis(emissions[:, t], cur[:, None], axis=1)[:, 0]
        return s + trans[prev, cur] + emit

    score = jax.lax.fori_loop(1, seq_len, num_step, score)
    score = score + end[tags[:, -1]]

    # denominator: log partition (forward algorithm)
    alpha = start[None, :] + emissions[:, 0]                      # (B, T)

    def den_step(t, a):
        nxt = a[:, :, None] + trans[None, :, :] + emissions[:, t][:, None, :]
        return _logsumexp(nxt, axis=1)

    alpha = jax.lax.fori_loop(1, seq_len, den_step, alpha)
    log_z = _logsumexp(alpha + end[None, :], axis=1)
    return jnp.sum(score - log_z)


# ----------------------------- params & forward ------------------------------

def init_params(key, vocab_size, embedded_size, hidden_size, num_layers,
                tagset_size, padding_idx=None):
    assert hidden_size % 2 == 0, "bidirectional encoder needs even hidden_size"
    per_dir = hidden_size // 2
    keys = jax.random.split(key, 4)

    emb = 0.1 * jax.random.normal(keys[0], (vocab_size, embedded_size), jnp.float32)
    if padding_idx is not None:
        emb = emb.at[padding_idx].set(0.0)

    k_gru = 1.0 / jnp.sqrt(jnp.float32(per_dir))
    gru = []
    layer_keys = jax.random.split(keys[1], num_layers * 2)
    for layer in range(num_layers):
        d_in = embedded_size if layer == 0 else hidden_size
        layer_p = []
        for direction in range(2):
            sub = jax.random.split(layer_keys[layer * 2 + direction], 4)
            # fused gate layout (r|z|n along the last axis)
            w_ih = jax.random.uniform(sub[0], (d_in, 3 * per_dir), jnp.float32, -k_gru, k_gru)
            w_hh = jax.random.uniform(sub[1], (per_dir, 3 * per_dir), jnp.float32, -k_gru, k_gru)
            b_ih = jax.random.uniform(sub[2], (1, 3 * per_dir), jnp.float32, -k_gru, k_gru)
            b_hh = jax.random.uniform(sub[3], (1, 3 * per_dir), jnp.float32, -k_gru, k_gru)
            layer_p.append((w_ih, w_hh, b_ih, b_hh))
        gru.append(tuple(layer_p))

    k_lin = 1.0 / jnp.sqrt(jnp.float32(hidden_size))
    lin_keys = jax.random.split(keys[2], 2)
    w_tag = jax.random.uniform(lin_keys[0], (hidden_size, tagset_size),
                               jnp.float32, -k_lin, k_lin)
    b_tag = jax.random.uniform(lin_keys[1], (tagset_size,), jnp.float32, -k_lin, k_lin)

    crf_keys = jax.random.split(keys[3], 3)
    crf = (
        jax.random.uniform(crf_keys[0], (tagset_size,), jnp.float32, -0.1, 0.1),
        jax.random.uniform(crf_keys[1], (tagset_size,), jnp.float32, -0.1, 0.1),
        jax.random.uniform(crf_keys[2], (tagset_size, tagset_size), jnp.float32, -0.1, 0.1),
    )
    return {"embedding": emb, "gru": gru, "w_tag": w_tag, "b_tag": b_tag, "crf": crf}


def birnn_crf_forward(params, tokens, labels=None):
    """Equivalent of BiRNN_CRFOptimized.forward((tokens,), labels)."""
    # Embedding lookup (glue): (B, S) -> (B, S, E)
    emb = jnp.take(params["embedding"], tokens, axis=0).astype(jnp.float32)

    logits = birnn_gru_tag(emb, params["gru"], params["w_tag"], params["b_tag"])

    if labels is None:
        return (logits,)
    llh = crf_log_likelihood(logits, labels, params["crf"])
    return (-1.0 * llh, logits)


# ----------------------------- driver ----------------------------------------

if __name__ == "__main__":
    batch, seq_len = 2, 8
    vocab_size = 50
    embedded_size = 32
    hidden_size = 32
    num_layers = 2
    tag_to_ix = {"O": 0, "B-PER": 1, "I-PER": 2, "B-LOC": 3, "I-LOC": 4}
    tagset_size = len(tag_to_ix)

    key = jax.random.PRNGKey(0)
    k_params, k_tok, k_lab = jax.random.split(key, 3)

    params = init_params(k_params, vocab_size, embedded_size, hidden_size,
                         num_layers, tagset_size, padding_idx=0)
    tokens = jax.random.randint(k_tok, (batch, seq_len), 1, vocab_size, dtype=jnp.int32)
    labels = jax.random.randint(k_lab, (batch, seq_len), 0, tagset_size, dtype=jnp.int32)

    neg_llh, logits = birnn_crf_forward(params, tokens, labels)
    jax.block_until_ready((neg_llh, logits))

    assert logits.shape == (batch, seq_len, tagset_size)
    assert logits.dtype == jnp.float32
    assert neg_llh.shape == ()
    assert bool(jnp.isfinite(neg_llh))
    assert bool(jnp.all(jnp.isfinite(logits)))

    # inference path (labels=None) -> (logits,)
    (logits_only,) = birnn_crf_forward(params, tokens, None)
    jax.block_until_ready(logits_only)
    assert logits_only.shape == (batch, seq_len, tagset_size)

    print("KERNEL_OK")
</pallas_src>

<mosaic_0001>
module attributes {stable_mosaic.version = 11 : i64} {
  func.func @_birnn_gru_tag_kernel(%arg0: i32, %arg1: memref<16x32xbf16, #tpu.memory_space<vmem>>, %arg2: memref<32x96xbf16, #tpu.memory_space<vmem>>, %arg3: memref<32x96xf32, #tpu.memory_space<vmem>>, %arg4: memref<1x96xf32, #tpu.memory_space<vmem>>, %arg5: memref<1x96xf32, #tpu.memory_space<vmem>>, %arg6: memref<32x96xbf16, #tpu.memory_space<vmem>>, %arg7: memref<32x96xf32, #tpu.memory_space<vmem>>, %arg8: memref<1x96xf32, #tpu.memory_space<vmem>>, %arg9: memref<1x96xf32, #tpu.memory_space<vmem>>, %arg10: memref<32x128xbf16, #tpu.memory_space<vmem>>, %arg11: memref<1x128xf32, #tpu.memory_space<vmem>>, %arg12: memref<16x128xf32, #tpu.memory_space<vmem>>, %arg13: memref<16x64xf32, #tpu.memory_space<vmem>>, %arg14: memref<16x32xf32, #tpu.memory_space<vmem>>, %arg15: memref<16x32xf32, #tpu.memory_space<vmem>>, %arg16: memref<16x32xf32, #tpu.memory_space<vmem>>) attributes {dimension_semantics = [#tpu.dimension_semantics<parallel>], iteration_bounds = array<i64: 1>, scalar_prefetch = 0 : i64, scratch_operands = 4 : i64, tpu.core_type = #tpu.core_type<tc>, window_params = [{transform_indices = @transform_0, window_bounds = array<i64: 16, 32>}, {pipeline_mode = #tpu.pipeline_mode<synchronous>, transform_indices = @transform_1, window_bounds = array<i64: 32, 96>}, {pipeline_mode = #tpu.pipeline_mode<synchronous>, transform_indices = @transform_2, window_bounds = array<i64: 32, 96>}, {pipeline_mode = #tpu.pipeline_mode<synchronous>, transform_indices = @transform_3, window_bounds = array<i64: 1, 96>}, {pipeline_mode = #tpu.pipeline_mode<synchronous>, transform_indices = @transform_4, window_bounds = array<i64: 1, 96>}, {pipeline_mode = #tpu.pipeline_mode<synchronous>, transform_indices = @transform_5, window_bounds = array<i64: 32, 96>}, {pipeline_mode = #tpu.pipeline_mode<synchronous>, transform_indices = @transform_6, window_bounds = array<i64: 32, 96>}, {pipeline_mode = #tpu.pipeline_mode<synchronous>, transform_indices = @transform_7, window_bounds = array<i64: 1, 96>}, {pipeline_mode = #tpu.pipeline_mode<synchronous>, transform_indices = @transform_8, window_bounds = array<i64: 1, 96>}, {pipeline_mode = #tpu.pipeline_mode<synchronous>, transform_indices = @transform_9, window_bounds = array<i64: 32, 128>}, {pipeline_mode = #tpu.pipeline_mode<synchronous>, transform_indices = @transform_10, window_bounds = array<i64: 1, 128>}, {transform_indices = @transform_11, window_bounds = array<i64: 16, 128>}]} {
    %c0 = arith.constant 0 : index
    %c0_0 = arith.constant 0 : index
    %0 = vector.load %arg1[%c0, %c0_0] : memref<16x32xbf16, #tpu.memory_space<vmem>>, vector<16x32xbf16>
    %c0_1 = arith.constant 0 : index
    %c0_2 = arith.constant 0 : index
    %1 = vector.load %arg2[%c0_1, %c0_2] : memref<32x96xbf16, #tpu.memory_space<vmem>>, vector<32x96xbf16>
    %cst = arith.constant dense<0.000000e+00> : vector<16x96xf32>
    %2 = tpu.matmul %0, %1, %cst {dimension_numbers = #tpu.dot_dimension_numbers<[1], [0], [0], [1], [0, 0, 1, 1], [], []>} : vector<16x32xbf16>, vector<32x96xbf16>, vector<16x96xf32> -> vector<16x96xf32>
    %c0_3 = arith.constant 0 : index
    %c0_4 = arith.constant 0 : index
    %3 = vector.load %arg4[%c0_3, %c0_4] : memref<1x96xf32, #tpu.memory_space<vmem>>, vector<1x96xf32>
    %4 = vector.broadcast %3 : vector<1x96xf32> to vector<16x96xf32>
    %5 = arith.addf %2, %4 : vector<16x96xf32>
    %6 = vector.extract_strided_slice %5 {offsets = [0, 0], sizes = [16, 16], strides = [1, 1]} : vector<16x96xf32> to vector<16x16xf32>
    %7 = vector.extract_strided_slice %5 {offsets = [0, 16], sizes = [16, 16], strides = [1, 1]} : vector<16x96xf32> to vector<16x16xf32>
    %8 = vector.extract_strided_slice %7 {offsets = [14, 0], sizes = [2, 16], strides = [1, 1]} : vector<16x16xf32> to vector<2x16xf32>
    %9 = vector.extract_strided_slice %7 {offsets = [12, 0], sizes = [2, 16], strides = [1, 1]} : vector<16x16xf32> to vector<2x16xf32>
    %10 = vector.extract_strided_slice %7 {offsets = [10, 0], sizes = [2, 16], strides = [1, 1]} : vector<16x16xf32> to vector<2x16xf32>
    %11 = vector.extract_strided_slice %7 {offsets = [8, 0], sizes = [2, 16], strides = [1, 1]} : vector<16x16xf32> to vector<2x16xf32>
    %12 = vector.extract_strided_slice %7 {offsets = [6, 0], sizes = [2, 16], strides = [1, 1]} : vector<16x16xf32> to vector<2x16xf32>
    %13 = vector.extract_strided_slice %7 {offsets = [4, 0], sizes = [2, 16], strides = [1, 1]} : vector<16x16xf32> to vector<2x16xf32>
    %14 = vector.extract_strided_slice %7 {offsets = [2, 0], sizes = [2, 16], strides = [1, 1]} : vector<16x16xf32> to vector<2x16xf32>
    %15 = vector.extract_strided_slice %7 {offsets = [0, 0], sizes = [2, 16], strides = [1, 1]} : vector<16x16xf32> to vector<2x16xf32>
    %16 = tpu.concatenate %8, %9, %10, %11, %12, %13, %14, %15 in 0 : vector<2x16xf32>, vector<2x16xf32>, vector<2x16xf32>, vector<2x16xf32>, vector<2x16xf32>, vector<2x16xf32>, vector<2x16xf32>, vector<2x16xf32> -> vector<16x16xf32>
    %17 = vector.extract_strided_slice %5 {offsets = [0, 32], sizes = [16, 16], strides = [1, 1]} : vector<16x96xf32> to vector<16x16xf32>
    %18 = vector.extract_strided_slice %5 {offsets = [0, 48], sizes = [16, 16], strides = [1, 1]} : vector<16x96xf32> to vector<16x16xf32>
    %19 = vector.extract_strided_slice %18 {offsets = [14, 0], sizes = [2, 16], strides = [1, 1]} : vector<16x16xf32> to vector<2x16xf32>
    %20 = vector.extract_strided_slice %18 {offsets = [12, 0], sizes = [2, 16], strides = [1, 1]} : vector<16x16xf32> to vector<2x16xf32>
    %21 = vector.extract_strided_slice %18 {offsets = [10, 0], sizes = [2, 16], strides = [1, 1]} : vector<16x16xf32> to vector<2x16xf32>
    %22 = vector.extract_strided_slice %18 {offsets = [8, 0], sizes = [2, 16], strides = [1, 1]} : vector<16x16xf32> to vector<2x16xf32>
    %23 = vector.extract_strided_slice %18 {offsets = [6, 0], sizes = [2, 16], strides = [1, 1]} : vector<16x16xf32> to vector<2x16xf32>
    %24 = vector.extract_strided_slice %18 {offsets = [4, 0], sizes = [2, 16], strides = [1, 1]} : vector<16x16xf32> to vector<2x16xf32>
    %25 = vector.extract_strided_slice %18 {offsets = [2, 0], sizes = [2, 16], strides = [1, 1]} : vector<16x16xf32> to vector<2x16xf32>
    %26 = vector.extract_strided_slice %18 {offsets = [0, 0], sizes = [2, 16], strides = [1, 1]} : vector<16x16xf32> to vector<2x16xf32>
    %27 = tpu.concatenate %19, %20, %21, %22, %23, %24, %25, %26 in 0 : vector<2x16xf32>, vector<2x16xf32>, vector<2x16xf32>, vector<2x16xf32>, vector<2x16xf32>, vector<2x16xf32>, vector<2x16xf32>, vector<2x16xf32> -> vector<16x16xf32>
    %28 = vector.extract_strided_slice %5 {offsets = [0, 64], sizes = [16, 16], strides = [1, 1]} : vector<16x96xf32> to vector<16x16xf32>
    %29 = vector.extract_strided_slice %5 {offsets = [0, 80], sizes = [16, 16], strides = [1, 1]} : vector<16x96xf32> to vector<16x16xf32>
    %30 = vector.extract_strided_slice %29 {offsets = [14, 0], sizes = [2, 16], strides = [1, 1]} : vector<16x16xf32> to vector<2x16xf32>
    %31 = vector.extract_strided_slice %29 {offsets = [12, 0], sizes = [2, 16], strides = [1, 1]} : vector<16x16xf32> to vector<2x16xf32>
    %32 = vector.extract_strided_slice %29 {offsets = [10, 0], sizes = [2, 16], strides = [1, 1]} : vector<16x16xf32> to vector<2x16xf32>
    %33 = vector.extract_strided_slice %29 {offsets = [8, 0], sizes = [2, 16], strides = [1, 1]} : vector<16x16xf32> to vector<2x16xf32>
    %34 = vector.extract_strided_slice %29 {offsets = [6, 0], sizes = [2, 16], strides = [1, 1]} : vector<16x16xf32> to vector<2x16xf32>
    %35 = vector.extract_strided_slice %29 {offsets = [4, 0], sizes = [2, 16], strides = [1, 1]} : vector<16x16xf32> to vector<2x16xf32>
    %36 = vector.extract_strided_slice %29 {offsets = [2, 0], sizes = [2, 16], strides = [1, 1]} : vector<16x16xf32> to vector<2x16xf32>
    %37 = vector.extract_strided_slice %29 {offsets = [0, 0], sizes = [2, 16], strides = [1, 1]} : vector<16x16xf32> to vector<2x16xf32>
    %38 = tpu.concatenate %30, %31, %32, %33, %34, %35, %36, %37 in 0 : vector<2x16xf32>, vector<2x16xf32>, vector<2x16xf32>, vector<2x16xf32>, vector<2x16xf32>, vector<2x16xf32>, vector<2x16xf32>, vector<2x16xf32> -> vector<16x16xf32>
    %39 = tpu.concatenate %6, %16, %17, %27 in 1 : vector<16x16xf32>, vector<16x16xf32>, vector<16x16xf32>, vector<16x16xf32> -> vector<16x64xf32>
    %c0_5 = arith.constant 0 : index
    %c0_6 = arith.constant 0 : index
    %40 = vector.load %arg13[%c0_5, %c0_6] : memref<16x64xf32, #tpu.memory_space<vmem>>, vector<16x64xf32>
    tpu.vector_store %arg13[%c0_5, %c0_6], %39 {strides = array<i32>} : memref<16x64xf32, #tpu.memory_space<vmem>>, vector<16x64xf32>,
    %41 = tpu.concatenate %28, %38 in 1 : vector<16x16xf32>, vector<16x16xf32> -> vector<16x32xf32>
    %c0_7 = arith.constant 0 : index
    %c0_8 = arith.constant 0 : index
    %42 = vector.load %arg14[%c0_7, %c0_8] : memref<16x32xf32, #tpu.memory_space<vmem>>, vector<16x32xf32>
    tpu.vector_store %arg14[%c0_7, %c0_8], %41 {strides = array<i32>} : memref<16x32xf32, #tpu.memory_space<vmem>>, vector<16x32xf32>,
    %c0_9 = arith.constant 0 : index
    %c0_10 = arith.constant 0 : index
    %43 = vector.load %arg3[%c0_9, %c0_10] : memref<32x96xf32, #tpu.memory_space<vmem>>, vector<32x96xf32>
    %c0_11 = arith.constant 0 : index
    %c0_12 = arith.constant 0 : index
    %44 = vector.load %arg5[%c0_11, %c0_12] : memref<1x96xf32, #tpu.memory_space<vmem>>, vector<1x96xf32>
    %45 = vector.shape_cast %44 : vector<1x96xf32> to vector<1x96xf32>
    %46 = vector.broadcast %45 : vector<1x96xf32> to vector<2x96xf32>
    %cst_13 = arith.constant 0.000000e+00 : f32
    %47 = vector.broadcast %cst_13 : f32 to vector<2x32xf32>
    %c0_i32 = arith.constant 0 : i32
    %c2_i32 = arith.constant 2 : i32
    %48 = arith.muli %c0_i32, %c2_i32 : i32
    %49 = arith.index_cast %48 : i32 to index
    %c0_14 = arith.constant 0 : index
    %50 = vector.load %arg13[%49, %c0_14] : memref<16x64xf32, #tpu.memory_space<vmem>>, vector<2x64xf32>
    %51 = arith.index_cast %48 : i32 to index
    %c0_15 = arith.constant 0 : index
    %52 = vector.load %arg14[%51, %c0_15] : memref<16x32xf32, #tpu.memory_space<vmem>>, vector<2x32xf32>
    %cst_16 = arith.constant dense<0.000000e+00> : vector<2x96xf32>
    %53 = tpu.matmul %47, %43, %cst_16 {dimension_numbers = #tpu.dot_dimension_numbers<[1], [0], [0], [1], [0, 0, 1, 1], [], []>} : vector<2x32xf32>, vector<32x96xf32>, vector<2x96xf32> -> vector<2x96xf32>
    %54 = arith.addf %53, %46 : vector<2x96xf32>
    %55 = vector.extract_strided_slice %54 {offsets = [0, 0], sizes = [2, 64], strides = [1, 1]} : vector<2x96xf32> to vector<2x64xf32>
    %56 = arith.addf %50, %55 : vector<2x64xf32>
    %57 = arith.negf %56 : vector<2x64xf32>
    %58 = math.exp %57 : vector<2x64xf32>
    %cst_17 = arith.constant 1.000000e+00 : f32
    %59 = vector.broadcast %cst_17 : f32 to vector<2x64xf32>
    %60 = arith.addf %59, %58 : vector<2x64xf32>
    %61 = arith.divf %59, %60 : vector<2x64xf32>
    %62 = vector.extract_strided_slice %61 {offsets = [0, 0], sizes = [2, 32], strides = [1, 1]} : vector<2x64xf32> to vector<2x32xf32>
    %63 = vector.extract_strided_slice %61 {offsets = [0, 32], sizes = [2, 32], strides = [1, 1]} : vector<2x64xf32> to vector<2x32xf32>
    %64 = vector.extract_strided_slice %54 {offsets = [0, 64], sizes = [2, 32], strides = [1, 1]} : vector<2x96xf32> to vector<2x32xf32>
    %65 = arith.mulf %62, %64 : vector<2x32xf32>
    %66 = arith.addf %52, %65 : vector<2x32xf32>
    %67 = math.tanh %66 : vector<2x32xf32>
    %68 = arith.subf %47, %67 : vector<2x32xf32>
    %69 = arith.mulf %63, %68 : vector<2x32xf32>
    %70 = arith.addf %69, %67 : vector<2x32xf32>
    %71 = arith.index_cast %48 : i32 to index
    %c0_18 = arith.constant 0 : index
    %72 = vector.load %arg15[%71, %c0_18] : memref<16x32xf32, #tpu.memory_space<vmem>>, vector<2x32xf32>
    tpu.vector_store %arg15[%71, %c0_18], %70 {strides = array<i32>} : memref<16x32xf32, #tpu.memory_space<vmem>>, vector<2x32xf32>,
    %c1_i32 = arith.constant 1 : i32
    %c2_i32_19 = arith.constant 2 : i32
    %73 = arith.muli %c1_i32, %c2_i32_19 : i32
    %74 = arith.index_cast %73 : i32 to index
    %c0_20 = arith.constant 0 : index
    %75 = vector.load %arg13[%74, %c0_20] : memref<16x64xf32, #tpu.memory_space<vmem>>, vector<2x64xf32>
    %76 = arith.index_cast %73 : i32 to index
    %c0_21 = arith.constant 0 : index
    %77 = vector.load %arg14[%76, %c0_21] : memref<16x32xf32, #tpu.memory_space<vmem>>, vector<2x32xf32>
    %cst_22 = arith.constant dense<0.000000e+00> : vector<2x96xf32>
    %78 = tpu.matmul %70, %43, %cst_22 {dimension_numbers = #tpu.dot_dimension_numbers<[1], [0], [0], [1], [0, 0, 1, 1], [], []>} : vector<2x32xf32>, vector<32x96xf32>, vector<2x96xf32> -> vector<2x96xf32>
    %79 = arith.addf %78, %46 : vector<2x96xf32>
    %80 = vector.extract_strided_slice %79 {offsets = [0, 0], sizes = [2, 64], strides = [1, 1]} : vector<2x96xf32> to vector<2x64xf32>
    %81 = arith.addf %75, %80 : vector<2x64xf32>
    %82 = arith.negf %81 : vector<2x64xf32>
    %83 = math.exp %82 : vector<2x64xf32>
    %cst_23 = arith.constant 1.000000e+00 : f32
    %84 = vector.broadcast %cst_23 : f32 to vector<2x64xf32>
    %85 = arith.addf %84, %83 : vector<2x64xf32>
    %86 = arith.divf %84, %85 : vector<2x64xf32>
    %87 = vector.extract_strided_slice %86 {offsets = [0, 0], sizes = [2, 32], strides = [1, 1]} : vector<2x64xf32> to vector<2x32xf32>
    %88 = vector.extract_strided_slice %86 {offsets = [0, 32], sizes = [2, 32], strides = [1, 1]} : vector<2x64xf32> to vector<2x32xf32>
    %89 = vector.extract_strided_slice %79 {offsets = [0, 64], sizes = [2, 32], strides = [1, 1]} : vector<2x96xf32> to vector<2x32xf32>
    %90 = arith.mulf %87, %89 : vector<2x32xf32>
    %91 = arith.addf %77, %90 : vector<2x32xf32>
    %92 = math.tanh %91 : vector<2x32xf32>
    %93 = arith.subf %70, %92 : vector<2x32xf32>
    %94 = arith.mulf %88, %93 : vector<2x32xf32>
    %95 = arith.addf %94, %92 : vector<2x32xf32>
    %96 = arith.index_cast %73 : i32 to index
    %c0_24 = arith.constant 0 : index
    %97 = vector.load %arg15[%96, %c0_24] : memref<16x32xf32, #tpu.memory_space<vmem>>, vector<2x32xf32>
    tpu.vector_store %arg15[%96, %c0_24], %95 {strides = array<i32>} : memref<16x32xf32, #tpu.memory_space<vmem>>, vector<2x32xf32>,
    %c2_i32_25 = arith.constant 2 : i32
    %c2_i32_26 = arith.constant 2 : i32
    %98 = arith.muli %c2_i32_25, %c2_i32_26 : i32
    %99 = arith.index_cast %98 : i32 to index
    %c0_27 = arith.constant 0 : index
    %100 = vector.load %arg13[%99, %c0_27] : memref<16x64xf32, #tpu.memory_space<vmem>>, vector<2x64xf32>
    %101 = arith.index_cast %98 : i32 to index
    %c0_28 = arith.constant 0 : index
    %102 = vector.load %arg14[%101, %c0_28] : memref<16x32xf32, #tpu.memory_space<vmem>>, vector<2x32xf32>
    %cst_29 = arith.constant dense<0.000000e+00> : vector<2x96xf32>
    %103 = tpu.matmul %95, %43, %cst_29 {dimension_numbers = #tpu.dot_dimension_numbers<[1], [0], [0], [1], [0, 0, 1, 1], [], []>} : vector<2x32xf32>, vector<32x96xf32>, vector<2x96xf32> -> vector<2x96xf32>
    %104 = arith.addf %103, %46 : vector<2x96xf32>
    %105 = vector.extract_strided_slice %104 {offsets = [0, 0], sizes = [2, 64], strides = [1, 1]} : vector<2x96xf32> to vector<2x64xf32>
    %106 = arith.addf %100, %105 : vector<2x64xf32>
    %107 = arith.negf %106 : vector<2x64xf32>
    %108 = math.exp %107 : vector<2x64xf32>
    %cst_30 = arith.constant 1.000000e+00 : f32
    %109 = vector.broadcast %cst_30 : f32 to vector<2x64xf32>
    %110 = arith.addf %109, %108 : vector<2x64xf32>
    %111 = arith.divf %109, %110 : vector<2x64xf32>
    %112 = vector.extract_strided_slice %111 {offsets = [0, 0], sizes = [2, 32], strides = [1, 1]} : vector<2x64xf32> to vector<2x32xf32>
    %113 = vector.extract_strided_slice %111 {offsets = [0, 32], sizes = [2, 32], strides = [1, 1]} : vector<2x64xf32> to vector<2x32xf32>
    %114 = vector.extract_strided_slice %104 {offsets = [0, 64], sizes = [2, 32], strides = [1, 1]} : vector<2x96xf32> to vector<2x32xf32>
    %115 = arith.mulf %112, %114 : vector<2x32xf32>
    %116 = arith.addf %102, %115 : vector<2x32xf32>
    %117 = math.tanh %116 : vector<2x32xf32>
    %118 = arith.subf %95, %117 : vector<2x32xf32>
    %119 = arith.mulf %113, %118 : vector<2x32xf32>
    %120 = arith.addf %119, %117 : vector<2x32xf32>
    %121 = arith.index_cast %98 : i32 to index
    %c0_31 = arith.constant 0 : index
    %122 = vector.load %arg15[%121, %c0_31] : memref<16x32xf32, #tpu.memory_space<vmem>>, vector<2x32xf32>
    tpu.vector_store %arg15[%121, %c0_31], %120 {strides = array<i32>} : memref<16x32xf32, #tpu.memory_space<vmem>>, vector<2x32xf32>,
    %c3_i32 = arith.constant 3 : i32
    %c2_i32_32 = arith.constant 2 : i32
    %123 = arith.muli %c3_i32, %c2_i32_32 : i32
    %124 = arith.index_cast %123 : i32 to index
    %c0_33 = arith.constant 0 : index
    %125 = vector.load %arg13[%124, %c0_33] : memref<16x64xf32, #tpu.memory_space<vmem>>, vector<2x64xf32>
    %126 = arith.index_cast %123 : i32 to index
    %c0_34 = arith.constant 0 : index
    %127 = vector.load %arg14[%126, %c0_34] : memref<16x32xf32, #tpu.memory_space<vmem>>, vector<2x32xf32>
    %cst_35 = arith.constant dense<0.000000e+00> : vector<2x96xf32>
    %128 = tpu.matmul %120, %43, %cst_35 {dimension_numbers = #tpu.dot_dimension_numbers<[1], [0], [0], [1], [0, 0, 1, 1], [], []>} : vector<2x32xf32>, vector<32x96xf32>, vector<2x96xf32> -> vector<2x96xf32>
    %129 = arith.addf %128, %46 : vector<2x96xf32>
    %130 = vector.extract_strided_slice %129 {offsets = [0, 0], sizes = [2, 64], strides = [1, 1]} : vector<2x96xf32> to vector<2x64xf32>
    %131 = arith.addf %125, %130 : vector<2x64xf32>
    %132 = arith.negf %131 : vector<2x64xf32>
    %133 = math.exp %132 : vector<2x64xf32>
    %cst_36 = arith.constant 1.000000e+00 : f32
    %134 = vector.broadcast %cst_36 : f32 to vector<2x64xf32>
    %135 = arith.addf %134, %133 : vector<2x64xf32>
    %136 = arith.divf %134, %135 : vector<2x64xf32>
    %137 = vector.extract_strided_slice %136 {offsets = [0, 0], sizes = [2, 32], strides = [1, 1]} : vector<2x64xf32> to vector<2x32xf32>
    %138 = vector.extract_strided_slice %136 {offsets = [0, 32], sizes = [2, 32], strides = [1, 1]} : vector<2x64xf32> to vector<2x32xf32>
    %139 = vector.extract_strided_slice %129 {offsets = [0, 64], sizes = [2, 32], strides = [1, 1]} : vector<2x96xf32> to vector<2x32xf32>
    %140 = arith.mulf %137, %139 : vector<2x32xf32>
    %141 = arith.addf %127, %140 : vector<2x32xf32>
    %142 = math.tanh %141 : vector<2x32xf32>
    %143 = arith.subf %120, %142 : vector<2x32xf32>
    %144 = arith.mulf %138, %143 : vector<2x32xf32>
    %145 = arith.addf %144, %142 : vector<2x32xf32>
    %146 = arith.index_cast %123 : i32 to index
    %c0_37 = arith.constant 0 : index
    %147 = vector.load %arg15[%146, %c0_37] : memref<16x32xf32, #tpu.memory_space<vmem>>, vector<2x32xf32>
    tpu.vector_store %arg15[%146, %c0_37], %145 {strides = array<i32>} : memref<16x32xf32, #tpu.memory_space<vmem>>, vector<2x32xf32>,
    %c4_i32 = arith.constant 4 : i32
    %c2_i32_38 = arith.constant 2 : i32
    %148 = arith.muli %c4_i32, %c2_i32_38 : i32
    %149 = arith.index_cast %148 : i32 to index
    %c0_39 = arith.constant 0 : index
    %150 = vector.load %arg13[%149, %c0_39] : memref<16x64xf32, #tpu.memory_space<vmem>>, vector<2x64xf32>
    %151 = arith.index_cast %148 : i32 to index
    %c0_40 = arith.constant 0 : index
    %152 = vector.load %arg14[%151, %c0_40] : memref<16x32xf32, #tpu.memory_space<vmem>>, vector<2x32xf32>
    %cst_41 = arith.constant dense<0.000000e+00> : vector<2x96xf32>
    %153 = tpu.matmul %145, %43, %cst_41 {dimension_numbers = #tpu.dot_dimension_numbers<[1], [0], [0], [1], [0, 0, 1, 1], [], []>} : vector<2x32xf32>, vector<32x96xf32>, vector<2x96xf32> -> vector<2x96xf32>
    %154 = arith.addf %153, %46 : vector<2x96xf32>
    %155 = vector.extract_strided_slice %154 {offsets = [0, 0], sizes = [2, 64], strides = [1, 1]} : vector<2x96xf32> to vector<2x64xf32>
    %156 = arith.addf %150, %155 : vector<2x64xf32>
    %157 = arith.negf %156 : vector<2x64xf32>
    %158 = math.exp %157 : vector<2x64xf32>
    %cst_42 = arith.constant 1.000000e+00 : f32
    %159 = vector.broadcast %cst_42 : f32 to vector<2x64xf32>
    %160 = arith.addf %159, %158 : vector<2x64xf32>
    %161 = arith.divf %159, %160 : vector<2x64xf32>
    %162 = vector.extract_strided_slice %161 {offsets = [0, 0], sizes = [2, 32], strides = [1, 1]} : vector<2x64xf32> to vector<2x32xf32>
    %163 = vector.extract_strided_slice %161 {offsets = [0, 32], sizes = [2, 32], strides = [1, 1]} : vector<2x64xf32> to vector<2x32xf32>
    %164 = vector.extract_strided_slice %154 {offsets = [0, 64], sizes = [2, 32], strides = [1, 1]} : vector<2x96xf32> to vector<2x32xf32>
    %165 = arith.mulf %162, %164 : vector<2x32xf32>
    %166 = arith.addf %152, %165 : vector<2x32xf32>
    %167 = math.tanh %166 : vector<2x32xf32>
    %168 = arith.subf %145, %167 : vector<2x32xf32>
    %169 = arith.mulf %163, %168 : vector<2x32xf32>
    %170 = arith.addf %169, %167 : vector<2x32xf32>
    %171 = arith.index_cast %148 : i32 to index
    %c0_43 = arith.constant 0 : index
    %172 = vector.load %arg15[%171, %c0_43] : memref<16x32xf32, #tpu.memory_space<vmem>>, vector<2x32xf32>
    tpu.vector_store %arg15[%171, %c0_43], %170 {strides = array<i32>} : memref<16x32xf32, #tpu.memory_space<vmem>>, vector<2x32xf32>,
    %c5_i32 = arith.constant 5 : i32
    %c2_i32_44 = arith.constant 2 : i32
    %173 = arith.muli %c5_i32, %c2_i32_44 : i32
    %174 = arith.index_cast %173 : i32 to index
    %c0_45 = arith.constant 0 : index
    %175 = vector.load %arg13[%174, %c0_45] : memref<16x64xf32, #tpu.memory_space<vmem>>, vector<2x64xf32>
    %176 = arith.index_cast %173 : i32 to index
    %c0_46 = arith.constant 0 : index
    %177 = vector.load %arg14[%176, %c0_46] : memref<16x32xf32, #tpu.memory_space<vmem>>, vector<2x32xf32>
    %cst_47 = arith.constant dense<0.000000e+00> : vector<2x96xf32>
    %178 = tpu.matmul %170, %43, %cst_47 {dimension_numbers = #tpu.dot_dimension_numbers<[1], [0], [0], [1], [0, 0, 1, 1], [], []>} : vector<2x32xf32>, vector<32x96xf32>, vector<2x96xf32> -> vector<2x96xf32>
    %179 = arith.addf %178, %46 : vector<2x96xf32>
    %180 = vector.extract_strided_slice %179 {offsets = [0, 0], sizes = [2, 64], strides = [1, 1]} : vector<2x96xf32> to vector<2x64xf32>
    %181 = arith.addf %175, %180 : vector<2x64xf32>
    %182 = arith.negf %181 : vector<2x64xf32>
    %183 = math.exp %182 : vector<2x64xf32>
    %cst_48 = arith.constant 1.000000e+00 : f32
    %184 = vector.broadcast %cst_48 : f32 to vector<2x64xf32>
    %185 = arith.addf %184, %183 : vector<2x64xf32>
    %186 = arith.divf %184, %185 : vector<2x64xf32>
    %187 = vector.extract_strided_slice %186 {offsets = [0, 0], sizes = [2, 32], strides = [1, 1]} : vector<2x64xf32> to vector<2x32xf32>
    %188 = vector.extract_strided_slice %186 {offsets = [0, 32], sizes = [2, 32], strides = [1, 1]} : vector<2x64xf32> to vector<2x32xf32>
    %189 = vector.extract_strided_slice %179 {offsets = [0, 64], sizes = [2, 32], strides = [1, 1]} : vector<2x96xf32> to vector<2x32xf32>
    %190 = arith.mulf %187, %189 : vector<2x32xf32>
    %191 = arith.addf %177, %190 : vector<2x32xf32>
    %192 = math.tanh %191 : vector<2x32xf32>
    %193 = arith.subf %170, %192 : vector<2x32xf32>
    %194 = arith.mulf %188, %193 : vector<2x32xf32>
    %195 = arith.addf %194, %192 : vector<2x32xf32>
    %196 = arith.index_cast %173 : i32 to index
    %c0_49 = arith.constant 0 : index
    %197 = vector.load %arg15[%196, %c0_49] : memref<16x32xf32, #tpu.memory_space<vmem>>, vector<2x32xf32>
    tpu.vector_store %arg15[%196, %c0_49], %195 {strides = array<i32>} : memref<16x32xf32, #tpu.memory_space<vmem>>, vector<2x32xf32>,
    %c6_i32 = arith.constant 6 : i32
    %c2_i32_50 = arith.constant 2 : i32
    %198 = arith.muli %c6_i32, %c2_i32_50 : i32
    %199 = arith.index_cast %198 : i32 to index
    %c0_51 = arith.constant 0 : index
    %200 = vector.load %arg13[%199, %c0_51] : memref<16x64xf32, #tpu.memory_space<vmem>>, vector<2x64xf32>
    %201 = arith.index_cast %198 : i32 to index
    %c0_52 = arith.constant 0 : index
    %202 = vector.load %arg14[%201, %c0_52] : memref<16x32xf32, #tpu.memory_space<vmem>>, vector<2x32xf32>
    %cst_53 = arith.constant dense<0.000000e+00> : vector<2x96xf32>
    %203 = tpu.matmul %195, %43, %cst_53 {dimension_numbers = #tpu.dot_dimension_numbers<[1], [0], [0], [1], [0, 0, 1, 1], [], []>} : vector<2x32xf32>, vector<32x96xf32>, vector<2x96xf32> -> vector<2x96xf32>
    %204 = arith.addf %203, %46 : vector<2x96xf32>
    %205 = vector.extract_strided_slice %204 {offsets = [0, 0], sizes = [2, 64], strides = [1, 1]} : vector<2x96xf32> to vector<2x64xf32>
    %206 = arith.addf %200, %205 : vector<2x64xf32>
    %207 = arith.negf %206 : vector<2x64xf32>
    %208 = math.exp %207 : vector<2x64xf32>
    %cst_54 = arith.constant 1.000000e+00 : f32
    %209 = vector.broadcast %cst_54 : f32 to vector<2x64xf32>
    %210 = arith.addf %209, %208 : vector<2x64xf32>
    %211 = arith.divf %209, %210 : vector<2x64xf32>
    %212 = vector.extract_strided_slice %211 {offsets = [0, 0], sizes = [2, 32], strides = [1, 1]} : vector<2x64xf32> to vector<2x32xf32>
    %213 = vector.extract_strided_slice %211 {offsets = [0, 32], sizes = [2, 32], strides = [1, 1]} : vector<2x64xf32> to vector<2x32xf32>
    %214 = vector.extract_strided_slice %204 {offsets = [0, 64], sizes = [2, 32], strides = [1, 1]} : vector<2x96xf32> to vector<2x32xf32>
    %215 = arith.mulf %212, %214 : vector<2x32xf32>
    %216 = arith.addf %202, %215 : vector<2x32xf32>
    %217 = math.tanh %216 : vector<2x32xf32>
    %218 = arith.subf %195, %217 : vector<2x32xf32>
    %219 = arith.mulf %213, %218 : vector<2x32xf32>
    %220 = arith.addf %219, %217 : vector<2x32xf32>
    %221 = arith.index_cast %198 : i32 to index
    %c0_55 = arith.constant 0 : index
    %222 = vector.load %arg15[%221, %c0_55] : memref<16x32xf32, #tpu.memory_space<vmem>>, vector<2x32xf32>
    tpu.vector_store %arg15[%221, %c0_55], %220 {strides = array<i32>} : memref<16x32xf32, #tpu.memory_space<vmem>>, vector<2x32xf32>,
    %c7_i32 = arith.constant 7 : i32
    %c2_i32_56 = arith.constant 2 : i32
    %223 = arith.muli %c7_i32, %c2_i32_56 : i32
    %224 = arith.index_cast %223 : i32 to index
    %c0_57 = arith.constant 0 : index
    %225 = vector.load %arg13[%224, %c0_57] : memref<16x64xf32, #tpu.memory_space<vmem>>, vector<2x64xf32>
    %226 = arith.index_cast %223 : i32 to index
    %c0_58 = arith.constant 0 : index
    %227 = vector.load %arg14[%226, %c0_58] : memref<16x32xf32, #tpu.memory_space<vmem>>, vector<2x32xf32>
    %cst_59 = arith.constant dense<0.000000e+00> : vector<2x96xf32>
    %228 = tpu.matmul %220, %43, %cst_59 {dimension_numbers = #tpu.dot_dimension_numbers<[1], [0], [0], [1], [0, 0, 1, 1], [], []>} : vector<2x32xf32>, vector<32x96xf32>, vector<2x96xf32> -> vector<2x96xf32>
    %229 = arith.addf %228, %46 : vector<2x96xf32>
    %230 = vector.extract_strided_slice %229 {offsets = [0, 0], sizes = [2, 64], strides = [1, 1]} : vector<2x96xf32> to vector<2x64xf32>
    %231 = arith.addf %225, %230 : vector<2x64xf32>
    %232 = arith.negf %231 : vector<2x64xf32>
    %233 = math.exp %232 : vector<2x64xf32>
    %cst_60 = arith.constant 1.000000e+00 : f32
    %234 = vector.broadcast %cst_60 : f32 to vector<2x64xf32>
    %235 = arith.addf %234, %233 : vector<2x64xf32>
    %236 = arith.divf %234, %235 : vector<2x64xf32>
    %237 = vector.extract_strided_slice %236 {offsets = [0, 0], sizes = [2, 32], strides = [1, 1]} : vector<2x64xf32> to vector<2x32xf32>
    %238 = vector.extract_strided_slice %236 {offsets = [0, 32], sizes = [2, 32], strides = [1, 1]} : vector<2x64xf32> to vector<2x32xf32>
    %239 = vector.extract_strided_slice %229 {offsets = [0, 64], sizes = [2, 32], strides = [1, 1]} : vector<2x96xf32> to vector<2x32xf32>
    %240 = arith.mulf %237, %239 : vector<2x32xf32>
    %241 = arith.addf %227, %240 : vector<2x32xf32>
    %242 = math.tanh %241 : vector<2x32xf32>
    %243 = arith.subf %220, %242 : vector<2x32xf32>
    %244 = arith.mulf %238, %243 : vector<2x32xf32>
    %245 = arith.addf %244, %242 : vector<2x32xf32>
    %246 = arith.index_cast %223 : i32 to index
    %c0_61 = arith.constant 0 : index
    %247 = vector.load %arg15[%246, %c0_61] : memref<16x32xf32, #tpu.memory_space<vmem>>, vector<2x32xf32>
    tpu.vector_store %arg15[%246, %c0_61], %245 {strides = array<i32>} : memref<16x32xf32, #tpu.memory_space<vmem>>, vector<2x32xf32>,
    %c8_i32 = arith.constant 8 : i32
    %c0_62 = arith.constant 0 : index
    %c0_63 = arith.constant 0 : index
    %248 = vector.load %arg15[%c0_62, %c0_63] : memref<16x32xf32, #tpu.memory_space<vmem>>, vector<16x16xf32>
    %c0_64 = arith.constant 0 : index
    %c16 = arith.constant 16 : index
    %249 = vector.load %arg15[%c0_64, %c16] : memref<16x32xf32, #tpu.memory_space<vmem>>, vector<16x16xf32>
    %250 = vector.extract_strided_slice %249 {offsets = [14, 0], sizes = [2, 16], strides = [1, 1]} : vector<16x16xf32> to vector<2x16xf32>
    %251 = vector.extract_strided_slice %249 {offsets = [12, 0], sizes = [2, 16], strides = [1, 1]} : vector<16x16xf32> to vector<2x16xf32>
    %252 = vector.extract_strided_slice %249 {offsets = [10, 0], sizes = [2, 16], strides = [1, 1]} : vector<16x16xf32> to vector<2x16xf32>
    %253 = vector.extract_strided_slice %249 {offsets = [8, 0], sizes = [2, 16], strides = [1, 1]} : vector<16x16xf32> to vector<2x16xf32>
    %254 = vector.extract_strided_slice %249 {offsets = [6, 0], sizes = [2, 16], strides = [1, 1]} : vector<16x16xf32> to vector<2x16xf32>
    %255 = vector.extract_strided_slice %249 {offsets = [4, 0], sizes = [2, 16], strides = [1, 1]} : vector<16x16xf32> to vector<2x16xf32>
    %256 = vector.extract_strided_slice %249 {offsets = [2, 0], sizes = [2, 16], strides = [1, 1]} : vector<16x16xf32> to vector<2x16xf32>
    %257 = vector.extract_strided_slice %249 {offsets = [0, 0], sizes = [2, 16], strides = [1, 1]} : vector<16x16xf32> to vector<2x16xf32>
    %258 = tpu.concatenate %250, %251, %252, %253, %254, %255, %256, %257 in 0 : vector<2x16xf32>, vector<2x16xf32>, vector<2x16xf32>, vector<2x16xf32>, vector<2x16xf32>, vector<2x16xf32>, vector<2x16xf32>, vector<2x16xf32> -> vector<16x16xf32>
    %259 = tpu.concatenate %248, %258 in 1 : vector<16x16xf32>, vector<16x16xf32> -> vector<16x32xf32>
    %c0_65 = arith.constant 0 : index
    %c0_66 = arith.constant 0 : index
    %260 = vector.load %arg16[%c0_65, %c0_66] : memref<16x32xf32, #tpu.memory_space<vmem>>, vector<16x32xf32>
    tpu.vector_store %arg16[%c0_65, %c0_66], %259 {strides = array<i32>} : memref<16x32xf32, #tpu.memory_space<vmem>>, vector<16x32xf32>,
    %c0_67 = arith.constant 0 : index
    %c0_68 = arith.constant 0 : index
    %261 = vector.load %arg16[%c0_67, %c0_68] : memref<16x32xf32, #tpu.memory_space<vmem>>, vector<16x32xf32>
    %262 = arith.truncf %261 : vector<16x32xf32> to vector<16x32xbf16>
    %c0_69 = arith.constant 0 : index
    %c0_70 = arith.constant 0 : index
    %263 = vector.load %arg6[%c0_69, %c0_70] : memref<32x96xbf16, #tpu.memory_space<vmem>>, vector<32x96xbf16>
    %cst_71 = arith.constant dense<0.000000e+00> : vector<16x96xf32>
    %264 = tpu.matmul %262, %263, %cst_71 {dimension_numbers = #tpu.dot_dimension_numbers<[1], [0], [0], [1], [0, 0, 1, 1], [], []>} : vector<16x32xbf16>, vector<32x96xbf16>, vector<16x96xf32> -> vector<16x96xf32>
    %c0_72 = arith.constant 0 : index
    %c0_73 = arith.constant 0 : index
    %265 = vector.load %arg8[%c0_72, %c0_73] : memref<1x96xf32, #tpu.memory_space<vmem>>, vector<1x96xf32>
    %266 = vector.broadcast %265 : vector<1x96xf32> to vector<16x96xf32>
    %267 = arith.addf %264, %266 : vector<16x96xf32>
    %268 = vector.extract_strided_slice %267 {offsets = [0, 0], sizes = [16, 16], strides = [1, 1]} : vector<16x96xf32> to vector<16x16xf32>
    %269 = vector.extract_strided_slice %267 {offsets = [0, 16], sizes = [16, 16], strides = [1, 1]} : vector<16x96xf32> to vector<16x16xf32>
    %270 = vector.extract_strided_slice %269 {offsets = [14, 0], sizes = [2, 16], strides = [1, 1]} : vector<16x16xf32> to vector<2x16xf32>
    %271 = vector.extract_strided_slice %269 {offsets = [12, 0], sizes = [2, 16], strides = [1, 1]} : vector<16x16xf32> to vector<2x16xf32>
    %272 = vector.extract_strided_slice %269 {offsets = [10, 0], sizes = [2, 16], strides = [1, 1]} : vector<16x16xf32> to vector<2x16xf32>
    %273 = vector.extract_strided_slice %269 {offsets = [8, 0], sizes = [2, 16], strides = [1, 1]} : vector<16x16xf32> to vector<2x16xf32>
    %274 = vector.extract_strided_slice %269 {offsets = [6, 0], sizes = [2, 16], strides = [1, 1]} : vector<16x16xf32> to vector<2x16xf32>
    %275 = vector.extract_strided_slice %269 {offsets = [4, 0], sizes = [2, 16], strides = [1, 1]} : vector<16x16xf32> to vector<2x16xf32>
    %276 = vector.extract_strided_slice %269 {offsets = [2, 0], sizes = [2, 16], strides = [1, 1]} : vector<16x16xf32> to vector<2x16xf32>
    %277 = vector.extract_strided_slice %269 {offsets = [0, 0], sizes = [2, 16], strides = [1, 1]} : vector<16x16xf32> to vector<2x16xf32>
    %278 = tpu.concatenate %270, %271, %272, %273, %274, %275, %276, %277 in 0 : vector<2x16xf32>, vector<2x16xf32>, vector<2x16xf32>, vector<2x16xf32>, vector<2x16xf32>, vector<2x16xf32>, vector<2x16xf32>, vector<2x16xf32> -> vector<16x16xf32>
    %279 = vector.extract_strided_slice %267 {offsets = [0, 32], sizes = [16, 16], strides = [1, 1]} : vector<16x96xf32> to vector<16x16xf32>
    %280 = vector.extract_strided_slice %267 {offsets = [0, 48], sizes = [16, 16], strides = [1, 1]} : vector<16x96xf32> to vector<16x16xf32>
    %281 = vector.extract_strided_slice %280 {offsets = [14, 0], sizes = [2, 16], strides = [1, 1]} : vector<16x16xf32> to vector<2x16xf32>
    %282 = vector.extract_strided_slice %280 {offsets = [12, 0], sizes = [2, 16], strides = [1, 1]} : vector<16x16xf32> to vector<2x16xf32>
    %283 = vector.extract_strided_slice %280 {offsets = [10, 0], sizes = [2, 16], strides = [1, 1]} : vector<16x16xf32> to vector<2x16xf32>
    %284 = vector.extract_strided_slice %280 {offsets = [8, 0], sizes = [2, 16], strides = [1, 1]} : vector<16x16xf32> to vector<2x16xf32>
    %285 = vector.extract_strided_slice %280 {offsets = [6, 0], sizes = [2, 16], strides = [1, 1]} : vector<16x16xf32> to vector<2x16xf32>
    %286 = vector.extract_strided_slice %280 {offsets = [4, 0], sizes = [2, 16], strides = [1, 1]} : vector<16x16xf32> to vector<2x16xf32>
    %287 = vector.extract_strided_slice %280 {offsets = [2, 0], sizes = [2, 16], strides = [1, 1]} : vector<16x16xf32> to vector<2x16xf32>
    %288 = vector.extract_strided_slice %280 {offsets = [0, 0], sizes = [2, 16], strides = [1, 1]} : vector<16x16xf32> to vector<2x16xf32>
    %289 = tpu.concatenate %281, %282, %283, %284, %285, %286, %287, %288 in 0 : vector<2x16xf32>, vector<2x16xf32>, vector<2x16xf32>, vector<2x16xf32>, vector<2x16xf32>, vector<2x16xf32>, vector<2x16xf32>, vector<2x16xf32> -> vector<16x16xf32>
    %290 = vector.extract_strided_slice %267 {offsets = [0, 64], sizes = [16, 16], strides = [1, 1]} : vector<16x96xf32> to vector<16x16xf32>
    %291 = vector.extract_strided_slice %267 {offsets = [0, 80], sizes = [16, 16], strides = [1, 1]} : vector<16x96xf32> to vector<16x16xf32>
    %292 = vector.extract_strided_slice %291 {offsets = [14, 0], sizes = [2, 16], strides = [1, 1]} : vector<16x16xf32> to vector<2x16xf32>
    %293 = vector.extract_strided_slice %291 {offsets = [12, 0], sizes = [2, 16], strides = [1, 1]} : vector<16x16xf32> to vector<2x16xf32>
    %294 = vector.extract_strided_slice %291 {offsets = [10, 0], sizes = [2, 16], strides = [1, 1]} : vector<16x16xf32> to vector<2x16xf32>
    %295 = vector.extract_strided_slice %291 {offsets = [8, 0], sizes = [2, 16], strides = [1, 1]} : vector<16x16xf32> to vector<2x16xf32>
    %296 = vector.extract_strided_slice %291 {offsets = [6, 0], sizes = [2, 16], strides = [1, 1]} : vector<16x16xf32> to vector<2x16xf32>
    %297 = vector.extract_strided_slice %291 {offsets = [4, 0], sizes = [2, 16], strides = [1, 1]} : vector<16x16xf32> to vector<2x16xf32>
    %298 = vector.extract_strided_slice %291 {offsets = [2, 0], sizes = [2, 16], strides = [1, 1]} : vector<16x16xf32> to vector<2x16xf32>
    %299 = vector.extract_strided_slice %291 {offsets = [0, 0], sizes = [2, 16], strides = [1, 1]} : vector<16x16xf32> to vector<2x16xf32>
    %300 = tpu.concatenate %292, %293, %294, %295, %296, %297, %298, %299 in 0 : vector<2x16xf32>, vector<2x16xf32>, vector<2x16xf32>, vector<2x16xf32>, vector<2x16xf32>, vector<2x16xf32>, vector<2x16xf32>, vector<2x16xf32> -> vector<16x16xf32>
    %301 = tpu.concatenate %268, %278, %279, %289 in 1 : vector<16x16xf32>, vector<16x16xf32>, vector<16x16xf32>, vector<16x16xf32> -> vector<16x64xf32>
    %c0_74 = arith.constant 0 : index
    %c0_75 = arith.constant 0 : index
    %302 = vector.load %arg13[%c0_74, %c0_75] : memref<16x64xf32, #tpu.memory_space<vmem>>, vector<16x64xf32>
    tpu.vector_store %arg13[%c0_74, %c0_75], %301 {strides = array<i32>} : memref<16x64xf32, #tpu.memory_space<vmem>>, vector<16x64xf32>,
    %303 = tpu.concatenate %290, %300 in 1 : vector<16x16xf32>, vector<16x16xf32> -> vector<16x32xf32>
    %c0_76 = arith.constant 0 : index
    %c0_77 = arith.constant 0 : index
    %304 = vector.load %arg14[%c0_76, %c0_77] : memref<16x32xf32, #tpu.memory_space<vmem>>, vector<16x32xf32>
    tpu.vector_store %arg14[%c0_76, %c0_77], %303 {strides = array<i32>} : memref<16x32xf32, #tpu.memory_space<vmem>>, vector<16x32xf32>,
    %c0_78 = arith.constant 0 : index
    %c0_79 = arith.constant 0 : index
    %305 = vector.load %arg7[%c0_78, %c0_79] : memref<32x96xf32, #tpu.memory_space<vmem>>, vector<32x96xf32>
    %c0_80 = arith.constant 0 : index
    %c0_81 = arith.constant 0 : index
    %306 = vector.load %arg9[%c0_80, %c0_81] : memref<1x96xf32, #tpu.memory_space<vmem>>, vector<1x96xf32>
    %307 = vector.shape_cast %306 : vector<1x96xf32> to vector<1x96xf32>
    %308 = vector.broadcast %307 : vector<1x96xf32> to vector<2x96xf32>
    %cst_82 = arith.constant 0.000000e+00 : f32
    %309 = vector.broadcast %cst_82 : f32 to vector<2x32xf32>
    %c0_i32_83 = arith.constant 0 : i32
    %c2_i32_84 = arith.constant 2 : i32
    %310 = arith.muli %c0_i32_83, %c2_i32_84 : i32
    %311 = arith.index_cast %310 : i32 to index
    %c0_85 = arith.constant 0 : index
    %312 = vector.load %arg13[%311, %c0_85] : memref<16x64xf32, #tpu.memory_space<vmem>>, vector<2x64xf32>
    %313 = arith.index_cast %310 : i32 to index
    %c0_86 = arith.constant 0 : index
    %314 = vector.load %arg14[%313, %c0_86] : memref<16x32xf32, #tpu.memory_space<vmem>>, vector<2x32xf32>
    %cst_87 = arith.constant dense<0.000000e+00> : vector<2x96xf32>
    %315 = tpu.matmul %309, %305, %cst_87 {dimension_numbers = #tpu.dot_dimension_numbers<[1], [0], [0], [1], [0, 0, 1, 1], [], []>} : vector<2x32xf32>, vector<32x96xf32>, vector<2x96xf32> -> vector<2x96xf32>
    %316 = arith.addf %315, %308 : vector<2x96xf32>
    %317 = vector.extract_strided_slice %316 {offsets = [0, 0], sizes = [2, 64], strides = [1, 1]} : vector<2x96xf32> to vector<2x64xf32>
    %318 = arith.addf %312, %317 : vector<2x64xf32>
    %319 = arith.negf %318 : vector<2x64xf32>
    %320 = math.exp %319 : vector<2x64xf32>
    %cst_88 = arith.constant 1.000000e+00 : f32
    %321 = vector.broadcast %cst_88 : f32 to vector<2x64xf32>
    %322 = arith.addf %321, %320 : vector<2x64xf32>
    %323 = arith.divf %321, %322 : vector<2x64xf32>
    %324 = vector.extract_strided_slice %323 {offsets = [0, 0], sizes = [2, 32], strides = [1, 1]} : vector<2x64xf32> to vector<2x32xf32>
    %325 = vector.extract_strided_slice %323 {offsets = [0, 32], sizes = [2, 32], strides = [1, 1]} : vector<2x64xf32> to vector<2x32xf32>
    %326 = vector.extract_strided_slice %316 {offsets = [0, 64], sizes = [2, 32], strides = [1, 1]} : vector<2x96xf32> to vector<2x32xf32>
    %327 = arith.mulf %324, %326 : vector<2x32xf32>
    %328 = arith.addf %314, %327 : vector<2x32xf32>
    %329 = math.tanh %328 : vector<2x32xf32>
    %330 = arith.subf %309, %329 : vector<2x32xf32>
    %331 = arith.mulf %325, %330 : vector<2x32xf32>
    %332 = arith.addf %331, %329 : vector<2x32xf32>
    %333 = arith.index_cast %310 : i32 to index
    %c0_89 = arith.constant 0 : index
    %334 = vector.load %arg15[%333, %c0_89] : memref<16x32xf32, #tpu.memory_space<vmem>>, vector<2x32xf32>
    tpu.vector_store %arg15[%333, %c0_89], %332 {strides = array<i32>} : memref<16x32xf32, #tpu.memory_space<vmem>>, vector<2x32xf32>,
    %c1_i32_90 = arith.constant 1 : i32
    %c2_i32_91 = arith.constant 2 : i32
    %335 = arith.muli %c1_i32_90, %c2_i32_91 : i32
    %336 = arith.index_cast %335 : i32 to index
    %c0_92 = arith.constant 0 : index
    %337 = vector.load %arg13[%336, %c0_92] : memref<16x64xf32, #tpu.memory_space<vmem>>, vector<2x64xf32>
    %338 = arith.index_cast %335 : i32 to index
    %c0_93 = arith.constant 0 : index
    %339 = vector.load %arg14[%338, %c0_93] : memref<16x32xf32, #tpu.memory_space<vmem>>, vector<2x32xf32>
    %cst_94 = arith.constant dense<0.000000e+00> : vector<2x96xf32>
    %340 = tpu.matmul %332, %305, %cst_94 {dimension_numbers = #tpu.dot_dimension_numbers<[1], [0], [0], [1], [0, 0, 1, 1], [], []>} : vector<2x32xf32>, vector<32x96xf32>, vector<2x96xf32> -> vector<2x96xf32>
    %341 = arith.addf %340, %308 : vector<2x96xf32>
    %342 = vector.extract_strided_slice %341 {offsets = [0, 0], sizes = [2, 64], strides = [1, 1]} : vector<2x96xf32> to vector<2x64xf32>
    %343 = arith.addf %337, %342 : vector<2x64xf32>
    %344 = arith.negf %343 : vector<2x64xf32>
    %345 = math.exp %344 : vector<2x64xf32>
    %cst_95 = arith.constant 1.000000e+00 : f32
    %346 = vector.broadcast %cst_95 : f32 to vector<2x64xf32>
    %347 = arith.addf %346, %345 : vector<2x64xf32>
    %348 = arith.divf %346, %347 : vector<2x64xf32>
    %349 = vector.extract_strided_slice %348 {offsets = [0, 0], sizes = [2, 32], strides = [1, 1]} : vector<2x64xf32> to vector<2x32xf32>
    %350 = vector.extract_strided_slice %348 {offsets = [0, 32], sizes = [2, 32], strides = [1, 1]} : vector<2x64xf32> to vector<2x32xf32>
    %351 = vector.extract_strided_slice %341 {offsets = [0, 64], sizes = [2, 32], strides = [1, 1]} : vector<2x96xf32> to vector<2x32xf32>
    %352 = arith.mulf %349, %351 : vector<2x32xf32>
    %353 = arith.addf %339, %352 : vector<2x32xf32>
    %354 = math.tanh %353 : vector<2x32xf32>
    %355 = arith.subf %332, %354 : vector<2x32xf32>
    %356 = arith.mulf %350, %355 : vector<2x32xf32>
    %357 = arith.addf %356, %354 : vector<2x32xf32>
    %358 = arith.index_cast %335 : i32 to index
    %c0_96 = arith.constant 0 : index
    %359 = vector.load %arg15[%358, %c0_96] : memref<16x32xf32, #tpu.memory_space<vmem>>, vector<2x32xf32>
    tpu.vector_store %arg15[%358, %c0_96], %357 {strides = array<i32>} : memref<16x32xf32, #tpu.memory_space<vmem>>, vector<2x32xf32>,
    %c2_i32_97 = arith.constant 2 : i32
    %c2_i32_98 = arith.constant 2 : i32
    %360 = arith.muli %c2_i32_97, %c2_i32_98 : i32
    %361 = arith.index_cast %360 : i32 to index
    %c0_99 = arith.constant 0 : index
    %362 = vector.load %arg13[%361, %c0_99] : memref<16x64xf32, #tpu.memory_space<vmem>>, vector<2x64xf32>
    %363 = arith.index_cast %360 : i32 to index
    %c0_100 = arith.constant 0 : index
    %364 = vector.load %arg14[%363, %c0_100] : memref<16x32xf32, #tpu.memory_space<vmem>>, vector<2x32xf32>
    %cst_101 = arith.constant dense<0.000000e+00> : vector<2x96xf32>
    %365 = tpu.matmul %357, %305, %cst_101 {dimension_numbers = #tpu.dot_dimension_numbers<[1], [0], [0], [1], [0, 0, 1, 1], [], []>} : vector<2x32xf32>, vector<32x96xf32>, vector<2x96xf32> -> vector<2x96xf32>
    %366 = arith.addf %365, %308 : vector<2x96xf32>
    %367 = vector.extract_strided_slice %366 {offsets = [0, 0], sizes = [2, 64], strides = [1, 1]} : vector<2x96xf32> to vector<2x64xf32>
    %368 = arith.addf %362, %367 : vector<2x64xf32>
    %369 = arith.negf %368 : vector<2x64xf32>
    %370 = math.exp %369 : vector<2x64xf32>
    %cst_102 = arith.constant 1.000000e+00 : f32
    %371 = vector.broadcast %cst_102 : f32 to vector<2x64xf32>
    %372 = arith.addf %371, %370 : vector<2x64xf32>
    %373 = arith.divf %371, %372 : vector<2x64xf32>
    %374 = vector.extract_strided_slice %373 {offsets = [0, 0], sizes = [2, 32], strides = [1, 1]} : vector<2x64xf32> to vector<2x32xf32>
    %375 = vector.extract_strided_slice %373 {offsets = [0, 32], sizes = [2, 32], strides = [1, 1]} : vector<2x64xf32> to vector<2x32xf32>
    %376 = vector.extract_strided_slice %366 {offsets = [0, 64], sizes = [2, 32], strides = [1, 1]} : vector<2x96xf32> to vector<2x32xf32>
    %377 = arith.mulf %374, %376 : vector<2x32xf32>
    %378 = arith.addf %364, %377 : vector<2x32xf32>
    %379 = math.tanh %378 : vector<2x32xf32>
    %380 = arith.subf %357, %379 : vector<2x32xf32>
    %381 = arith.mulf %375, %380 : vector<2x32xf32>
    %382 = arith.addf %381, %379 : vector<2x32xf32>
    %383 = arith.index_cast %360 : i32 to index
    %c0_103 = arith.constant 0 : index
    %384 = vector.load %arg15[%383, %c0_103] : memref<16x32xf32, #tpu.memory_space<vmem>>, vector<2x32xf32>
    tpu.vector_store %arg15[%383, %c0_103], %382 {strides = array<i32>} : memref<16x32xf32, #tpu.memory_space<vmem>>, vector<2x32xf32>,
    %c3_i32_104 = arith.constant 3 : i32
    %c2_i32_105 = arith.constant 2 : i32
    %385 = arith.muli %c3_i32_104, %c2_i32_105 : i32
    %386 = arith.index_cast %385 : i32 to index
    %c0_106 = arith.constant 0 : index
    %387 = vector.load %arg13[%386, %c0_106] : memref<16x64xf32, #tpu.memory_space<vmem>>, vector<2x64xf32>
    %388 = arith.index_cast %385 : i32 to index
    %c0_107 = arith.constant 0 : index
    %389 = vector.load %arg14[%388, %c0_107] : memref<16x32xf32, #tpu.memory_space<vmem>>, vector<2x32xf32>
    %cst_108 = arith.constant dense<0.000000e+00> : vector<2x96xf32>
    %390 = tpu.matmul %382, %305, %cst_108 {dimension_numbers = #tpu.dot_dimension_numbers<[1], [0], [0], [1], [0, 0, 1, 1], [], []>} : vector<2x32xf32>, vector<32x96xf32>, vector<2x96xf32> -> vector<2x96xf32>
    %391 = arith.addf %390, %308 : vector<2x96xf32>
    %392 = vector.extract_strided_slice %391 {offsets = [0, 0], sizes = [2, 64], strides = [1, 1]} : vector<2x96xf32> to vector<2x64xf32>
    %393 = arith.addf %387, %392 : vector<2x64xf32>
    %394 = arith.negf %393 : vector<2x64xf32>
    %395 = math.exp %394 : vector<2x64xf32>
    %cst_109 = arith.constant 1.000000e+00 : f32
    %396 = vector.broadcast %cst_109 : f32 to vector<2x64xf32>
    %397 = arith.addf %396, %395 : vector<2x64xf32>
    %398 = arith.divf %396, %397 : vector<2x64xf32>
    %399 = vector.extract_strided_slice %398 {offsets = [0, 0], sizes = [2, 32], strides = [1, 1]} : vector<2x64xf32> to vector<2x32xf32>
    %400 = vector.extract_strided_slice %398 {offsets = [0, 32], sizes = [2, 32], strides = [1, 1]} : vector<2x64xf32> to vector<2x32xf32>
    %401 = vector.extract_strided_slice %391 {offsets = [0, 64], sizes = [2, 32], strides = [1, 1]} : vector<2x96xf32> to vector<2x32xf32>
    %402 = arith.mulf %399, %401 : vector<2x32xf32>
    %403 = arith.addf %389, %402 : vector<2x32xf32>
    %404 = math.tanh %403 : vector<2x32xf32>
    %405 = arith.subf %382, %404 : vector<2x32xf32>
    %406 = arith.mulf %400, %405 : vector<2x32xf32>
    %407 = arith.addf %406, %404 : vector<2x32xf32>
    %408 = arith.index_cast %385 : i32 to index
    %c0_110 = arith.constant 0 : index
    %409 = vector.load %arg15[%408, %c0_110] : memref<16x32xf32, #tpu.memory_space<vmem>>, vector<2x32xf32>
    tpu.vector_store %arg15[%408, %c0_110], %407 {strides = array<i32>} : memref<16x32xf32, #tpu.memory_space<vmem>>, vector<2x32xf32>,
    %c4_i32_111 = arith.constant 4 : i32
    %c2_i32_112 = arith.constant 2 : i32
    %410 = arith.muli %c4_i32_111, %c2_i32_112 : i32
    %411 = arith.index_cast %410 : i32 to index
    %c0_113 = arith.constant 0 : index
    %412 = vector.load %arg13[%411, %c0_113] : memref<16x64xf32, #tpu.memory_space<vmem>>, vector<2x64xf32>
    %413 = arith.index_cast %410 : i32 to index
    %c0_114 = arith.constant 0 : index
    %414 = vector.load %arg14[%413, %c0_114] : memref<16x32xf32, #tpu.memory_space<vmem>>, vector<2x32xf32>
    %cst_115 = arith.constant dense<0.000000e+00> : vector<2x96xf32>
    %415 = tpu.matmul %407, %305, %cst_115 {dimension_numbers = #tpu.dot_dimension_numbers<[1], [0], [0], [1], [0, 0, 1, 1], [], []>} : vector<2x32xf32>, vector<32x96xf32>, vector<2x96xf32> -> vector<2x96xf32>
    %416 = arith.addf %415, %308 : vector<2x96xf32>
    %417 = vector.extract_strided_slice %416 {offsets = [0, 0], sizes = [2, 64], strides = [1, 1]} : vector<2x96xf32> to vector<2x64xf32>
    %418 = arith.addf %412, %417 : vector<2x64xf32>
    %419 = arith.negf %418 : vector<2x64xf32>
    %420 = math.exp %419 : vector<2x64xf32>
    %cst_116 = arith.constant 1.000000e+00 : f32
    %421 = vector.broadcast %cst_116 : f32 to vector<2x64xf32>
    %422 = arith.addf %421, %420 : vector<2x64xf32>
    %423 = arith.divf %421, %422 : vector<2x64xf32>
    %424 = vector.extract_strided_slice %423 {offsets = [0, 0], sizes = [2, 32], strides = [1, 1]} : vector<2x64xf32> to vector<2x32xf32>
    %425 = vector.extract_strided_slice %423 {offsets = [0, 32], sizes = [2, 32], strides = [1, 1]} : vector<2x64xf32> to vector<2x32xf32>
    %426 = vector.extract_strided_slice %416 {offsets = [0, 64], sizes = [2, 32], strides = [1, 1]} : vector<2x96xf32> to vector<2x32xf32>
    %427 = arith.mulf %424, %426 : vector<2x32xf32>
    %428 = arith.addf %414, %427 : vector<2x32xf32>
    %429 = math.tanh %428 : vector<2x32xf32>
    %430 = arith.subf %407, %429 : vector<2x32xf32>
    %431 = arith.mulf %425, %430 : vector<2x32xf32>
    %432 = arith.addf %431, %429 : vector<2x32xf32>
    %433 = arith.index_cast %410 : i32 to index
    %c0_117 = arith.constant 0 : index
    %434 = vector.load %arg15[%433, %c0_117] : memref<16x32xf32, #tpu.memory_space<vmem>>, vector<2x32xf32>
    tpu.vector_store %arg15[%433, %c0_117], %432 {strides = array<i32>} : memref<16x32xf32, #tpu.memory_space<vmem>>, vector<2x32xf32>,
    %c5_i32_118 = arith.constant 5 : i32
    %c2_i32_119 = arith.constant 2 : i32
    %435 = arith.muli %c5_i32_118, %c2_i32_119 : i32
    %436 = arith.index_cast %435 : i32 to index
    %c0_120 = arith.constant 0 : index
    %437 = vector.load %arg13[%436, %c0_120] : memref<16x64xf32, #tpu.memory_space<vmem>>, vector<2x64xf32>
    %438 = arith.index_cast %435 : i32 to index
    %c0_121 = arith.constant 0 : index
    %439 = vector.load %arg14[%438, %c0_121] : memref<16x32xf32, #tpu.memory_space<vmem>>, vector<2x32xf32>
    %cst_122 = arith.constant dense<0.000000e+00> : vector<2x96xf32>
    %440 = tpu.matmul %432, %305, %cst_122 {dimension_numbers = #tpu.dot_dimension_numbers<[1], [0], [0], [1], [0, 0, 1, 1], [], []>} : vector<2x32xf32>, vector<32x96xf32>, vector<2x96xf32> -> vector<2x96xf32>
    %441 = arith.addf %440, %308 : vector<2x96xf32>
    %442 = vector.extract_strided_slice %441 {offsets = [0, 0], sizes = [2, 64], strides = [1, 1]} : vector<2x96xf32> to vector<2x64xf32>
    %443 = arith.addf %437, %442 : vector<2x64xf32>
    %444 = arith.negf %443 : vector<2x64xf32>
    %445 = math.exp %444 : vector<2x64xf32>
    %cst_123 = arith.constant 1.000000e+00 : f32
    %446 = vector.broadcast %cst_123 : f32 to vector<2x64xf32>
    %447 = arith.addf %446, %445 : vector<2x64xf32>
    %448 = arith.divf %446, %447 : vector<2x64xf32>
    %449 = vector.extract_strided_slice %448 {offsets = [0, 0], sizes = [2, 32], strides = [1, 1]} : vector<2x64xf32> to vector<2x32xf32>
    %450 = vector.extract_strided_slice %448 {offsets = [0, 32], sizes = [2, 32], strides = [1, 1]} : vector<2x64xf32> to vector<2x32xf32>
    %451 = vector.extract_strided_slice %441 {offsets = [0, 64], sizes = [2, 32], strides = [1, 1]} : vector<2x96xf32> to vector<2x32xf32>
    %452 = arith.mulf %449, %451 : vector<2x32xf32>
    %453 = arith.addf %439, %452 : vector<2x32xf32>
    %454 = math.tanh %453 : vector<2x32xf32>
    %455 = arith.subf %432, %454 : vector<2x32xf32>
    %456 = arith.mulf %450, %455 : vector<2x32xf32>
    %457 = arith.addf %456, %454 : vector<2x32xf32>
    %458 = arith.index_cast %435 : i32 to index
    %c0_124 = arith.constant 0 : index
    %459 = vector.load %arg15[%458, %c0_124] : memref<16x32xf32, #tpu.memory_space<vmem>>, vector<2x32xf32>
    tpu.vector_store %arg15[%458, %c0_124], %457 {strides = array<i32>} : memref<16x32xf32, #tpu.memory_space<vmem>>, vector<2x32xf32>,
    %c6_i32_125 = arith.constant 6 : i32
    %c2_i32_126 = arith.constant 2 : i32
    %460 = arith.muli %c6_i32_125, %c2_i32_126 : i32
    %461 = arith.index_cast %460 : i32 to index
    %c0_127 = arith.constant 0 : index
    %462 = vector.load %arg13[%461, %c0_127] : memref<16x64xf32, #tpu.memory_space<vmem>>, vector<2x64xf32>
    %463 = arith.index_cast %460 : i32 to index
    %c0_128 = arith.constant 0 : index
    %464 = vector.load %arg14[%463, %c0_128] : memref<16x32xf32, #tpu.memory_space<vmem>>, vector<2x32xf32>
    %cst_129 = arith.constant dense<0.000000e+00> : vector<2x96xf32>
    %465 = tpu.matmul %457, %305, %cst_129 {dimension_numbers = #tpu.dot_dimension_numbers<[1], [0], [0], [1], [0, 0, 1, 1], [], []>} : vector<2x32xf32>, vector<32x96xf32>, vector<2x96xf32> -> vector<2x96xf32>
    %466 = arith.addf %465, %308 : vector<2x96xf32>
    %467 = vector.extract_strided_slice %466 {offsets = [0, 0], sizes = [2, 64], strides = [1, 1]} : vector<2x96xf32> to vector<2x64xf32>
    %468 = arith.addf %462, %467 : vector<2x64xf32>
    %469 = arith.negf %468 : vector<2x64xf32>
    %470 = math.exp %469 : vector<2x64xf32>
    %cst_130 = arith.constant 1.000000e+00 : f32
    %471 = vector.broadcast %cst_130 : f32 to vector<2x64xf32>
    %472 = arith.addf %471, %470 : vector<2x64xf32>
    %473 = arith.divf %471, %472 : vector<2x64xf32>
    %474 = vector.extract_strided_slice %473 {offsets = [0, 0], sizes = [2, 32], strides = [1, 1]} : vector<2x64xf32> to vector<2x32xf32>
    %475 = vector.extract_strided_slice %473 {offsets = [0, 32], sizes = [2, 32], strides = [1, 1]} : vector<2x64xf32> to vector<2x32xf32>
    %476 = vector.extract_strided_slice %466 {offsets = [0, 64], sizes = [2, 32], strides = [1, 1]} : vector<2x96xf32> to vector<2x32xf32>
    %477 = arith.mulf %474, %476 : vector<2x32xf32>
    %478 = arith.addf %464, %477 : vector<2x32xf32>
    %479 = math.tanh %478 : vector<2x32xf32>
    %480 = arith.subf %457, %479 : vector<2x32xf32>
    %481 = arith.mulf %475, %480 : vector<2x32xf32>
    %482 = arith.addf %481, %479 : vector<2x32xf32>
    %483 = arith.index_cast %460 : i32 to index
    %c0_131 = arith.constant 0 : index
    %484 = vector.load %arg15[%483, %c0_131] : memref<16x32xf32, #tpu.memory_space<vmem>>, vector<2x32xf32>
    tpu.vector_store %arg15[%483, %c0_131], %482 {strides = array<i32>} : memref<16x32xf32, #tpu.memory_space<vmem>>, vector<2x32xf32>,
    %c7_i32_132 = arith.constant 7 : i32
    %c2_i32_133 = arith.constant 2 : i32
    %485 = arith.muli %c7_i32_132, %c2_i32_133 : i32
    %486 = arith.index_cast %485 : i32 to index
    %c0_134 = arith.constant 0 : index
    %487 = vector.load %arg13[%486, %c0_134] : memref<16x64xf32, #tpu.memory_space<vmem>>, vector<2x64xf32>
    %488 = arith.index_cast %485 : i32 to index
    %c0_135 = arith.constant 0 : index
    %489 = vector.load %arg14[%488, %c0_135] : memref<16x32xf32, #tpu.memory_space<vmem>>, vector<2x32xf32>
    %cst_136 = arith.constant dense<0.000000e+00> : vector<2x96xf32>
    %490 = tpu.matmul %482, %305, %cst_136 {dimension_numbers = #tpu.dot_dimension_numbers<[1], [0], [0], [1], [0, 0, 1, 1], [], []>} : vector<2x32xf32>, vector<32x96xf32>, vector<2x96xf32> -> vector<2x96xf32>
    %491 = arith.addf %490, %308 : vector<2x96xf32>
    %492 = vector.extract_strided_slice %491 {offsets = [0, 0], sizes = [2, 64], strides = [1, 1]} : vector<2x96xf32> to vector<2x64xf32>
    %493 = arith.addf %487, %492 : vector<2x64xf32>
    %494 = arith.negf %493 : vector<2x64xf32>
    %495 = math.exp %494 : vector<2x64xf32>
    %cst_137 = arith.constant 1.000000e+00 : f32
    %496 = vector.broadcast %cst_137 : f32 to vector<2x64xf32>
    %497 = arith.addf %496, %495 : vector<2x64xf32>
    %498 = arith.divf %496, %497 : vector<2x64xf32>
    %499 = vector.extract_strided_slice %498 {offsets = [0, 0], sizes = [2, 32], strides = [1, 1]} : vector<2x64xf32> to vector<2x32xf32>
    %500 = vector.extract_strided_slice %498 {offsets = [0, 32], sizes = [2, 32], strides = [1, 1]} : vector<2x64xf32> to vector<2x32xf32>
    %501 = vector.extract_strided_slice %491 {offsets = [0, 64], sizes = [2, 32], strides = [1, 1]} : vector<2x96xf32> to vector<2x32xf32>
    %502 = arith.mulf %499, %501 : vector<2x32xf32>
    %503 = arith.addf %489, %502 : vector<2x32xf32>
    %504 = math.tanh %503 : vector<2x32xf32>
    %505 = arith.subf %482, %504 : vector<2x32xf32>
    %506 = arith.mulf %500, %505 : vector<2x32xf32>
    %507 = arith.addf %506, %504 : vector<2x32xf32>
    %508 = arith.index_cast %485 : i32 to index
    %c0_138 = arith.constant 0 : index
    %509 = vector.load %arg15[%508, %c0_138] : memref<16x32xf32, #tpu.memory_space<vmem>>, vector<2x32xf32>
    tpu.vector_store %arg15[%508, %c0_138], %507 {strides = array<i32>} : memref<16x32xf32, #tpu.memory_space<vmem>>, vector<2x32xf32>,
    %c8_i32_139 = arith.constant 8 : i32
    %c0_140 = arith.constant 0 : index
    %c0_141 = arith.constant 0 : index
    %510 = vector.load %arg15[%c0_140, %c0_141] : memref<16x32xf32, #tpu.memory_space<vmem>>, vector<16x16xf32>
    %c0_142 = arith.constant 0 : index
    %c16_143 = arith.constant 16 : index
    %511 = vector.load %arg15[%c0_142, %c16_143] : memref<16x32xf32, #tpu.memory_space<vmem>>, vector<16x16xf32>
    %512 = vector.extract_strided_slice %511 {offsets = [14, 0], sizes = [2, 16], strides = [1, 1]} : vector<16x16xf32> to vector<2x16xf32>
    %513 = vector.extract_strided_slice %511 {offsets = [12, 0], sizes = [2, 16], strides = [1, 1]} : vector<16x16xf32> to vector<2x16xf32>
    %514 = vector.extract_strided_slice %511 {offsets = [10, 0], sizes = [2, 16], strides = [1, 1]} : vector<16x16xf32> to vector<2x16xf32>
    %515 = vector.extract_strided_slice %511 {offsets = [8, 0], sizes = [2, 16], strides = [1, 1]} : vector<16x16xf32> to vector<2x16xf32>
    %516 = vector.extract_strided_slice %511 {offsets = [6, 0], sizes = [2, 16], strides = [1, 1]} : vector<16x16xf32> to vector<2x16xf32>
    %517 = vector.extract_strided_slice %511 {offsets = [4, 0], sizes = [2, 16], strides = [1, 1]} : vector<16x16xf32> to vector<2x16xf32>
    %518 = vector.extract_strided_slice %511 {offsets = [2, 0], sizes = [2, 16], strides = [1, 1]} : vector<16x16xf32> to vector<2x16xf32>
    %519 = vector.extract_strided_slice %511 {offsets = [0, 0], sizes = [2, 16], strides = [1, 1]} : vector<16x16xf32> to vector<2x16xf32>
    %520 = tpu.concatenate %512, %513, %514, %515, %516, %517, %518, %519 in 0 : vector<2x16xf32>, vector<2x16xf32>, vector<2x16xf32>, vector<2x16xf32>, vector<2x16xf32>, vector<2x16xf32>, vector<2x16xf32>, vector<2x16xf32> -> vector<16x16xf32>
    %521 = tpu.concatenate %510, %520 in 1 : vector<16x16xf32>, vector<16x16xf32> -> vector<16x32xf32>
    %c0_144 = arith.constant 0 : index
    %c0_145 = arith.constant 0 : index
    %522 = vector.load %arg16[%c0_144, %c0_145] : memref<16x32xf32, #tpu.memory_space<vmem>>, vector<16x32xf32>
    tpu.vector_store %arg16[%c0_144, %c0_145], %521 {strides = array<i32>} : memref<16x32xf32, #tpu.memory_space<vmem>>, vector<16x32xf32>,
    %c0_146 = arith.constant 0 : index
    %c0_147 = arith.constant 0 : index
    %523 = vector.load %arg16[%c0_146, %c0_147] : memref<16x32xf32, #tpu.memory_space<vmem>>, vector<16x32xf32>
    %524 = arith.truncf %523 : vector<16x32xf32> to vector<16x32xbf16>
    %c0_148 = arith.constant 0 : index
    %c0_149 = arith.constant 0 : index
    %525 = vector.load %arg10[%c0_148, %c0_149] : memref<32x128xbf16, #tpu.memory_space<vmem>>, vector<32x128xbf16>
    %cst_150 = arith.constant dense<0.000000e+00> : vector<16x128xf32>
    %526 = tpu.matmul %524, %525, %cst_150 {dimension_numbers = #tpu.dot_dimension_numbers<[1], [0], [0], [1], [0, 0, 1, 1], [], []>} : vector<16x32xbf16>, vector<32x128xbf16>, vector<16x128xf32> -> vector<16x128xf32>
    %c0_151 = arith.constant 0 : index
    %c0_152 = arith.constant 0 : index
    %527 = vector.load %arg11[%c0_151, %c0_152] : memref<1x128xf32, #tpu.memory_space<vmem>>, vector<1x128xf32>
    %528 = vector.broadcast %527 : vector<1x128xf32> to vector<16x128xf32>
    %529 = arith.addf %526, %528 : vector<16x128xf32>
    %c0_153 = arith.constant 0 : index
    %c0_154 = arith.constant 0 : index
    %530 = vector.load %arg12[%c0_153, %c0_154] : memref<16x128xf32, #tpu.memory_space<vmem>>, vector<16x128xf32>
    tpu.vector_store %arg12[%c0_153, %c0_154], %529 {strides = array<i32>} : memref<16x128xf32, #tpu.memory_space<vmem>>, vector<16x128xf32>,
    return
  }
  func.func @transform_0(%arg0: i32) -> (i32, i32) {
    %c0_i32 = arith.constant 0 : i32
    %c0_i32_0 = arith.constant 0 : i32
    return %arg0, %c0_i32 : i32, i32
  }
  func.func @transform_1(%arg0: i32) -> (i32, i32) {
    %c0_i32 = arith.constant 0 : i32
    %c0_i32_0 = arith.constant 0 : i32
    %c0_i32_1 = arith.constant 0 : i32
    return %c0_i32, %c0_i32_0 : i32, i32
  }
  func.func @transform_2(%arg0: i32) -> (i32, i32) {
    %c0_i32 = arith.constant 0 : i32
    %c0_i32_0 = arith.constant 0 : i32
    %c0_i32_1 = arith.constant 0 : i32
    return %c0_i32, %c0_i32_0 : i32, i32
  }
  func.func @transform_3(%arg0: i32) -> (i32, i32) {
    %c0_i32 = arith.constant 0 : i32
    %c0_i32_0 = arith.constant 0 : i32
    %c0_i32_1 = arith.constant 0 : i32
    return %c0_i32, %c0_i32_0 : i32, i32
  }
  func.func @transform_4(%arg0: i32) -> (i32, i32) {
    %c0_i32 = arith.constant 0 : i32
    %c0_i32_0 = arith.constant 0 : i32
    %c0_i32_1 = arith.constant 0 : i32
    return %c0_i32, %c0_i32_0 : i32, i32
  }
  func.func @transform_5(%arg0: i32) -> (i32, i32) {
    %c0_i32 = arith.constant 0 : i32
    %c0_i32_0 = arith.constant 0 : i32
    %c0_i32_1 = arith.constant 0 : i32
    return %c0_i32, %c0_i32_0 : i32, i32
  }
  func.func @transform_6(%arg0: i32) -> (i32, i32) {
    %c0_i32 = arith.constant 0 : i32
    %c0_i32_0 = arith.constant 0 : i32
    %c0_i32_1 = arith.constant 0 : i32
    return %c0_i32, %c0_i32_0 : i32, i32
  }
  func.func @transform_7(%arg0: i32) -> (i32, i32) {
    %c0_i32 = arith.constant 0 : i32
    %c0_i32_0 = arith.constant 0 : i32
    %c0_i32_1 = arith.constant 0 : i32
    return %c0_i32, %c0_i32_0 : i32, i32
  }
  func.func @transform_8(%arg0: i32) -> (i32, i32) {
    %c0_i32 = arith.constant 0 : i32
    %c0_i32_0 = arith.constant 0 : i32
    %c0_i32_1 = arith.constant 0 : i32
    return %c0_i32, %c0_i32_0 : i32, i32
  }
  func.func @transform_9(%arg0: i32) -> (i32, i32) {
    %c0_i32 = arith.constant 0 : i32
    %c0_i32_0 = arith.constant 0 : i32
    %c0_i32_1 = arith.constant 0 : i32
    return %c0_i32, %c0_i32_0 : i32, i32
  }
  func.func @transform_10(%arg0: i32) -> (i32, i32) {
    %c0_i32 = arith.constant 0 : i32
    %c0_i32_0 = arith.constant 0 : i32
    %c0_i32_1 = arith.constant 0 : i32
    return %c0_i32, %c0_i32_0 : i32, i32
  }
  func.func @transform_11(%arg0: i32) -> (i32, i32) {
    %c0_i32 = arith.constant 0 : i32
    %c0_i32_0 = arith.constant 0 : i32
    return %arg0, %c0_i32 : i32, i32
  }
}

</mosaic_0001>

<bundles_post_ra>
// kernel: tpu_custom_call.1
= control target key start
LH: loop header
LB: loop body
LE: loop exit
PB: predicated region body
PF: predicated region fallthrough
CT: control target
= control target key end

     0   :  { %16 = vsyncpa [#allocation7], 0  ;;  %s3337_s0 = inlined_call_operand.hbm [shape: bf16[16,32], index: 0, kind: input, shape index: {}]   ;;  %s3338_s1 = inlined_call_operand.hbm [shape: bf16[32,96], index: 1, kind: input, shape index: {}]   ;;  %s3339_s2 = inlined_call_operand.hbm [shape: f32[32,96], index: 2, kind: input, shape index: {}]   ;;  %s3340_s3 = inlined_call_operand.vmem [shape: f32[1,96], index: 3, kind: input, shape index: {}]   ;;  %s3341_s4 = inlined_call_operand.vmem [shape: f32[1,96], index: 4, kind: input, shape index: {}]   ;;  %s3342_s5 = inlined_call_operand.vmem [shape: bf16[32,96], index: 5, kind: input, shape index: {}]   ;;  %s3343_s6 = inlined_call_operand.hbm [shape: f32[32,96], index: 6, kind: input, shape index: {}]   ;;  %s3344_s7 = inlined_call_operand.hbm [shape: f32[1,96], index: 7, kind: input, shape index: {}]   ;;  %s3345_s8 = inlined_call_operand.hbm [shape: f32[1,96], index: 8, kind: input, shape index: {}]   ;;  %s3346_s9 = inlined_call_operand.vmem [shape: bf16[32,128], index: 9, kind: input, shape index: {}]   ;;  %s3347_s10 = inlined_call_operand.vmem [shape: f32[1,128], index: 10, kind: input, shape index: {}]   ;;  %s3348_s11 = inlined_call_operand.hbm [shape: f32[16,128], index: 11, kind: output, shape index: {}]  }
   0x1   :  { %17 = vsyncpa [#allocation10], 0 }
   0x2   :  { %18 = vsyncpa [#allocation13], 0 }
   0x3   :  { %19 = vsyncpa [#allocation16], 0 }
   0x4   :  { %20 = vsyncpa [#allocation8], 0  ;;  %s2832_s17 = smov [#allocation9]   ;;  %s2668_s21 = scalar_lea.hbm %s3338_s1, 256 }
   0x5   :  { %s38_s18 = sshll.u32 %s2832_s17, 4  ;;  %p2669_p0 = scmp.ne.s32.totalorder %s3338_s1, %s2668_s21  ;;  %s39_s18 = int_to_ptr.vmem [resolvable:$true] %s38_s18 }
   0x6   :  { %p2672_p1 = scmp.lt.u32.totalorder %s2668_s21, %s3338_s1 }
   0x8   :  { %p2674_p2 = pnand %p2672_p1, %p2669_p0 }
   0xa   :  { %2677 = shalt.err (!%p2674_p2)
}
   0xb   :  { %s2678_s26 = scalar_lea.vmem %s39_s18, 256  ;;  %p2683_p4 = scmp.lt.s32.totalorder %s39_s18, %s39_s18 }
   0xc   :  { %p2679_p3 = scmp.ne.s32.totalorder %s39_s18, %s2678_s26  ;;  %p2684_p5 = scmp.lt.s32.totalorder %s2678_s26, %s2678_s26 }
   0xe   :  { %p2685_p6 = por %p2684_p5, %p2683_p4 }
  0x10   :  { %p2686_p7 = pnand %p2685_p6, %p2679_p3 }
  0x12   :  { %2689 = shalt.err (!%p2686_p7)
}
  0x13   :  { %s2833_s27 = smov 64   ;;  %s2834_s28 = smov 4  }
  0x14   :  { %44 = dma.hbm_to_vmem [thread:$0]  %s3338_s1, 256, %s39_s18, [#allocation10], %s2833_s27, %s2833_s27, %s2834_s28  }
  0x15   :  { %s2835_s12 = smov [#allocation12]   ;;  %s2836_s14 = smov [#allocation6]  }
  0x16   :  { %s68_s13 = sshll.u32 %s2835_s12, 4  ;;  %s26_s15 = sshll.u32 %s2836_s14, 4  ;;  %s69_s13 = int_to_ptr.vmem [resolvable:$true] %s68_s13  ;;  %s27_s15 = int_to_ptr.vmem [resolvable:$true] %s26_s15 }
  0x17   :  { %s2690_s19 = scalar_lea.hbm %s3343_s6, 512 }
  0x18   :  { %p2691_p8 = scmp.ne.s32.totalorder %s3343_s6, %s2690_s19  ;;  %p2694_p9 = scmp.lt.u32.totalorder %s2690_s19, %s3343_s6 }
  0x1a   :  { %p2696_p10 = pnand %p2694_p9, %p2691_p8 }
  0x1c   :  { %2699 = shalt.err (!%p2696_p10)
}
  0x1d   :  { %s2700_s1 = scalar_lea.vmem %s69_s13, 512  ;;  %p2705_p12 = scmp.lt.s32.totalorder %s69_s13, %s69_s13 }
  0x1e   :  { %p2701_p11 = scmp.ne.s32.totalorder %s69_s13, %s2700_s1  ;;  %p2706_p13 = scmp.lt.s32.totalorder %s2700_s1, %s2700_s1 }
  0x20   :  { %p2707_p0 = por %p2706_p13, %p2705_p12 }
  0x22   :  { %p2708_p1 = pnand %p2707_p0, %p2701_p11 }
  0x24   :  { %2711 = shalt.err (!%p2708_p1)
}
  0x25   :  { %s2837_s18 = smov 128   ;;  %s2838_s24 = smov 8  }
  0x26   :  { %74 = dma.hbm_to_vmem [thread:$0]  %s3343_s6, 512, %s69_s13, [#allocation13], %s2837_s18, %s2837_s18, %s2838_s24  }
  0x27   :  { %s2712_s12 = scalar_lea.hbm %s3337_s0, 128 }
  0x28   :  { %p2713_p2 = scmp.ne.s32.totalorder %s3337_s0, %s2712_s12  ;;  %p2716_p3 = scmp.lt.u32.totalorder %s2712_s12, %s3337_s0 }
  0x2a   :  { %p2718_p4 = pnand %p2716_p3, %p2713_p2 }
  0x2c   :  { %2721 = shalt.err (!%p2718_p4)
}
  0x2d   :  { %s2722_s20 = scalar_lea.vmem %s27_s15, 128  ;;  %p2727_p6 = scmp.lt.s32.totalorder %s27_s15, %s27_s15 }
  0x2e   :  { %p2723_p5 = scmp.ne.s32.totalorder %s27_s15, %s2722_s20  ;;  %p2728_p7 = scmp.lt.s32.totalorder %s2722_s20, %s2722_s20 }
  0x30   :  { %p2729_p8 = por %p2728_p7, %p2727_p6 }
  0x32   :  { %p2730_p9 = pnand %p2729_p8, %p2723_p5 }
  0x34   :  { %2733 = shalt.err (!%p2730_p9)
}
  0x35   :  { %32 = dma.hbm_to_vmem [thread:$0]  %s3337_s0, 128, %s27_s15, [#allocation7], %s2833_s27, %s2833_s27, %s2834_s28  }
  0x36   :  { %s2839_s21 = smov [#allocation11]   ;;  %s2840_s23 = smov [#allocation14]  }
  0x37   :  { %s50_s22 = sshll.u32 %s2839_s21, 4  ;;  %s81_s1 = sshll.u32 %s2840_s23, 4  ;;  %s51_s22 = int_to_ptr.vmem [resolvable:$true] %s50_s22  ;;  %s82_s1 = int_to_ptr.vmem [resolvable:$true] %s81_s1 }
  0x38   :  { %s2734_s29 = scalar_lea.hbm %s3339_s2, 512 }
  0x39   :  { %p2735_p10 = scmp.ne.s32.totalorder %s3339_s2, %s2734_s29  ;;  %p2738_p11 = scmp.lt.u32.totalorder %s2734_s29, %s3339_s2 }
  0x3b   :  { %p2740_p12 = pnand %p2738_p11, %p2735_p10 }
  0x3d   :  { %2743 = shalt.err (!%p2740_p12)
}
  0x3e   :  { %s2744_s0 = scalar_lea.vmem %s51_s22, 512  ;;  %p2749_p0 = scmp.lt.s32.totalorder %s51_s22, %s51_s22 }
  0x3f   :  { %p2745_p13 = scmp.ne.s32.totalorder %s51_s22, %s2744_s0  ;;  %p2750_p1 = scmp.lt.s32.totalorder %s2744_s0, %s2744_s0 }
  0x41   :  { %p2751_p2 = por %p2750_p1, %p2749_p0 }
  0x43   :  { %p2752_p3 = pnand %p2751_p2, %p2745_p13 }
  0x45   :  { %2755 = shalt.err (!%p2752_p3)
}
  0x46   :  { %56 = dma.hbm_to_vmem [thread:$0]  %s3339_s2, 512, %s51_s22, [#allocation10], %s2837_s18, %s2837_s18, %s2838_s24  }
  0x47   :  { %s2756_s20 = scalar_lea.hbm %s3344_s7, 16 }
  0x48   :  { %p2757_p4 = scmp.ne.s32.totalorder %s3344_s7, %s2756_s20  ;;  %p2760_p5 = scmp.lt.u32.totalorder %s2756_s20, %s3344_s7 }
  0x4a   :  { %p2762_p6 = pnand %p2760_p5, %p2757_p4 }
  0x4c   :  { %2765 = shalt.err (!%p2762_p6)
}
  0x4d   :  { %s2766_s25 = scalar_lea.vmem %s82_s1, 16  ;;  %s2770_s26 = scalar_lea.vmem %s82_s1, 32 }
  0x4e   :  { %p2767_p7 = scmp.ne.s32.totalorder %s82_s1, %s2766_s25  ;;  %p2771_p8 = scmp.lt.s32.totalorder %s82_s1, %s82_s1 }
  0x4f   :  { %p2772_p9 = scmp.lt.s32.totalorder %s2770_s26, %s2766_s25 }
  0x51   :  { %p2773_p10 = por %p2772_p9, %p2771_p8 }
  0x53   :  { %p2774_p11 = pnand %p2773_p10, %p2767_p7 }
  0x55   :  { %2777 = shalt.err (!%p2774_p11)
}
  0x56   :  { %84 = dma.hbm_to_vmem [thread:$0]  %s3344_s7, 16, %s82_s1, [#allocation13]  }
  0x57   :  { %s2841_s29 = smov [#allocation15]   ;;  %s2778_s16 = scalar_lea.hbm %s3345_s8, 16 }
  0x58   :  { %s91_s30 = sshll.u32 %s2841_s29, 4  ;;  %p2779_p12 = scmp.ne.s32.totalorder %s3345_s8, %s2778_s16  ;;  %s92_s30 = int_to_ptr.vmem [resolvable:$true] %s91_s30 }
  0x59   :  { %p2782_p13 = scmp.lt.u32.totalorder %s2778_s16, %s3345_s8 }
  0x5b   :  { %p2784_p0 = pnand %p2782_p13, %p2779_p12 }
  0x5d   :  { %2787 = shalt.err (!%p2784_p0)
}
  0x5e   :  { %s2788_s19 = scalar_lea.vmem %s92_s30, 16  ;;  %s2792_s7 = scalar_lea.vmem %s92_s30, 32 }
  0x5f   :  { %p2789_p1 = scmp.ne.s32.totalorder %s92_s30, %s2788_s19  ;;  %p2793_p2 = scmp.lt.s32.totalorder %s92_s30, %s92_s30 }
  0x60   :  { %p2794_p3 = scmp.lt.s32.totalorder %s2792_s7, %s2788_s19 }
  0x62   :  { %p2795_p4 = por %p2794_p3, %p2793_p2 }
  0x64   :  { %p2796_p5 = pnand %p2795_p4, %p2789_p1 }
  0x66   :  { %2799 = shalt.err (!%p2796_p5)
}
  0x67   :  { %94 = dma.hbm_to_vmem [thread:$0]  %s3345_s8, 16, %s92_s30, [#allocation16]  }
  0x68   :  { %2822 = dma.done.wait [#allocation7], 128  }
  0x69   :  { %2823 = vsyncadd [#allocation7], 4294967168 }
  0x6a   :  { %2824 = dma.done.wait [#allocation10], 768  }
  0x6b   :  { %2825 = vsyncadd [#allocation10], 4294966528 }
  0x6c   :  { %2826 = dma.done.wait [#allocation13], 528  }
  0x6d   :  { %2827 = vsyncadd [#allocation13], 4294966768 }
  0x6e   :  { %2828 = dma.done.wait [#allocation16], 16  }
  0x6f   :  { %2829 = vsyncadd [#allocation16], 4294967280  ;;  %v2842_v0 = vmov 0.0   ;;  %vm2843_vm0 = vmmov 0   ;;  %v2844_v1 = vmov 0.0|0.0   ;;  %v2565_v2 = vld [vmem:[#allocation9] sm:$0xff]  }
  0x70   :  { %2253 = vmatprep.subr.bf16.mxu1 %v2842_v0  ;;  %2257 = vmatprep.mubr.msk.bf16.mxu1 %vm2843_vm0, %v2842_v0  ;;  %v2566_v3 = vld [vmem:[#allocation9 + $0x8] sm:$0xff]   ;;  %v2567_v4 = vld [vmem:[#allocation6] sm:$0xff]   ;;  %v241_v5 = vld [vmem:[#allocation11] sm:$0xff]  ;;  %vm148_vm1 = vcmask 261120   ;;  %vm203_vm2 = vcmask 1041408   ;;  %vm205_vm3 = vcmask 1043456  }
  0x71   :  { %2459 = vmatprep.subr.bf16.mxu0 %v2844_v1  ;;  %2280 = vmatprep.mubr.msk.f32.mxu0 %vm2843_vm0, %v2842_v0  ;;  %v242_v6 = vld [vmem:[#allocation11 + $0x8] sm:$0xff]  ;;  %v243_v8 = vld [vmem:[#allocation11 + $0x10] sm:$0xff]  ;;  %v244_v9 = vld [vmem:[#allocation11 + $0x18] sm:$0xff]  ;;  %vm207_vm4 = vcmask 1045504   ;;  %vm212_vm5 = vcmask 130048   ;;  %vm217_vm6 = vcmask 392192  }
  0x72   :  { %2254 = vmatpush3.bf16.msra.mxu1 %v2565_v2  ;;  %v2999_v7 = vpack.c.bf16 %v242_v6, %v241_v5  ;;  %v3005_v10 = vpack.c.bf16 %v244_v9, %v243_v8  ;;  %v2119_v11 = vld [vmem:[%s3340_s3] ss:$0 sm:$0xff]  ;;  %vm220_vm7 = vcmask 523264   ;;  %s2846_s21 = smov 96   ;;  %vm356_vm8 = vcmask 254976   ;;  %s2847_s12 = smov [#allocation17]  }
  0x73   :  { %2255 = vmatprep.subr.bf16.mxu1 %v2842_v0  ;;  %v3034_v23 = vld [vmem:[%s3341_s4] ss:$0 sm:$0xff]  ;;  %s2845_s4 = smov 32   ;;  %s2104_s14 = sshll.u32 %s2847_s12, 4  ;;  %s2105_s14 = int_to_ptr.vmem [resolvable:$true] %s2104_s14 }
  0x74   :  { %2461 = vmatpush3.bf16.msra.mxu0 %v2999_v7  ;;  %s2800_s16 = scalar_lea.vmem %s2105_s14, 256  ;;  %p2805_p7 = scmp.lt.s32.totalorder %s2105_s14, %s2105_s14 }
  0x75   :  { %2462 = vmatprep.subr.bf16.mxu0 %v2844_v1  ;;  %p2801_p6 = scmp.ne.s32.totalorder %s2105_s14, %s2800_s16  ;;  %p2806_p8 = scmp.lt.s32.totalorder %s2800_s16, %s2800_s16 }
  0x76   :  { %2256 = vmatpush3.bf16.msra.mxu1 %v2566_v3 }
  0x77   :  { %2453 = vmatprep.subr.bf16.mxu1 %v2844_v1  ;;  %p2807_p9 = por %p2806_p8, %p2805_p7 }
  0x78   :  { %2464 = vmatpush3.bf16.msra.mxu0 %v3005_v10 }
  0x79   :  { %2258 = vmatmul.mubr.msk.bf16.vlgmr.msra.gmra.mrb[0].mxu1 %vm148_vm1, %v2567_v4  ;;  %2471 = vmatprep.subr.bf16.mxu0 %v2844_v1  ;;  %p2808_p10 = pnand %p2807_p9, %p2801_p6 }
  0x7a   :  { %2455 = vmatpush3.bf16.msra.mxu1 %v2999_v7  ;;  %2269 = vmatprep.mubr.msk.f32.mxu1 %vm2843_vm0, %v2842_v0 }
  0x7b   :  { %2456 = vmatprep.subr.bf16.mxu1 %v2844_v1 }
  0x7e   :  { %2458 = vmatpush3.bf16.msra.mxu1 %v3005_v10 }
  0x7f   :  { %2465 = vmatprep.subr.bf16.mxu1 %v2844_v1 }
  0x81   :  { %2270 = vmatmul.mubr.f32.vlgmr.msra.gmra.mrb[4].mxu1 %v2842_v0 }
  0x82   :  { %2467 = vmatpush3.bf16.msra.mxu1 %v2999_v7  ;;  %2291 = vmatprep.mubr.msk.f32.mxu1 %vm2843_vm0, %v2842_v0 }
  0x83   :  { %2468 = vmatprep.subr.bf16.mxu1 %v2844_v1 }
  0x86   :  { %2470 = vmatpush3.bf16.msra.mxu1 %v3005_v10 }
  0x87   :  { %2477 = vmatprep.subr.bf16.mxu1 %v2844_v1 }
 0x14c   :  { %v186_v12 = vpop.f32.mrb[0].mxu1 }
 0x14d   :  { %v187_v13 = vadd.f32 %v2119_v11, %v186_v12  ;;  %v2259_v14 = vpop.f32.mrb[1].mxu1 }
 0x14e   :  { %v189_v15 = vpop.f32.mrb[2].mxu1 }
 0x14f   :  { %v3025_v16 = vadd.f32 %v2119_v11, %v189_v15  ;;  %223 = vrot.lane.b32.xlu0 %v187_v13, %s2833_s27  ;;  %v2260_v17 = vpop.f32.mrb[3].mxu1  ;;  %v199_v18 = vrot.slane %v187_v13, 6  ;;  %v201_v19 = vrot.slane %v187_v13, 2 }
 0x151   :  { %v194_v20 = vrot.slane %v3025_v16, 6  ;;  %v196_v21 = vrot.slane %v3025_v16, 2  ;;  %v209_v22 = vsel %vm203_vm2, %v199_v18, %v201_v19 }
 0x152   :  { %v210_v24 = vsel %vm205_vm3, %v209_v22, %v199_v18 }
 0x153   :  { %v204_v25 = vsel %vm203_vm2, %v194_v20, %v196_v21  ;;  %v3039_v26 = vsel %vm207_vm4, %v210_v24, %v201_v19 }
 0x154   :  { %v323_v27 = vpop.f32.mrb[4].mxu1  ;;  %v206_v28 = vsel %vm205_vm3, %v204_v25, %v194_v20  ;;  %v214_v29 = vsel %vm212_vm5, %v3025_v16, %v3039_v26 }
 0x155   :  { %v324_v30 = vadd.f32 %v3034_v23, %v323_v27  ;;  %v208_v31 = vsel %vm207_vm4, %v206_v28, %v196_v21  ;;  %v2271_v32 = vpop.f32.mrb[5].mxu1  ;;  %v216_v33 = vsel %vm148_vm1, %v214_v29, %v3025_v16 }
 0x156   :  { %231 = vrot.lane.b32.xlu0 %v208_v31, %s2833_s27  ;;  %v213_v34 = vsel %vm212_vm5, %v187_v13, %v208_v31  ;;  %v219_v35 = vsel %vm217_vm6, %v216_v33, %v3039_v26 }
 0x157   :  { %v215_v36 = vsel %vm148_vm1, %v213_v34, %v187_v13  ;;  %335 = vrot.lane.b32.xlu1 %v324_v30, %s2833_s27  ;;  %222 = vst.msk [vmem:[#allocation2 + $0x8] sm:$0xff] %vm220_vm7, %v219_v35 }
 0x158   :  { %v218_v37 = vsel %vm217_vm6, %v215_v36, %v208_v31 }
 0x159   :  { %221 = vst.msk [vmem:[#allocation2] sm:$0xff] %vm220_vm7, %v218_v37 }
 0x160   :  { %v252_v38 = vld [vmem:[#allocation2] sm:$0x3]  ;;  %v358_v61 = vld [vmem:[#allocation2 + $0x2] sm:$0x3]  ;;  %v458_v21 = vld [vmem:[#allocation2 + $0x4] sm:$0x3] }
 0x161   :  { %v327_v39 = vadd.f32 %v324_v30, %v252_v38 }
 0x163   :  { %v2125_v40 = vmul.f32 -1.442695, %v327_v39 }
 0x165   :  { %2572 = vpow2.f32 %v2125_v40 }
 0x16f   :  { %v2573_v41 = vpop.eup %2572 }
 0x170   :  { %v331_v42 = vadd.f32 1.0, %v2573_v41 }
 0x172   :  { %2574 = vrcp.f32 %v331_v42  ;;  %v558_v42 = vld [vmem:[#allocation2 + $0x6] sm:$0x3] }
 0x17c   :  { %v2575_v47 = vpop.eup %2574 }
 0x1c1   :  { %v224_v43 = vpop.permute.xlu0 %223 }
 0x1c8   :  { %v232_v44 = vpop.permute.xlu0 %231 }
 0x1c9   :  { %v237_v45 = vsel %vm212_vm5, %v224_v43, %v232_v44  ;;  %v336_v46 = vpop.permute.xlu1 %335 }
 0x1ca   :  { %239 = vst.msk [vmem:[#allocation3] sm:$0xff] %vm148_vm1, %v237_v45  ;;  %v338_v48 = vmul.f32 %v2575_v47, %v336_v46 }
 0x1d1   :  { %v253_v49 = vld [vmem:[#allocation3] sm:$0x3]  ;;  %v359_v8 = vld [vmem:[#allocation3 + $0x2] sm:$0x3]  ;;  %v459_v31 = vld [vmem:[#allocation3 + $0x4] sm:$0x3] }
 0x1d2   :  { %v339_v50 = vadd.f32 %v338_v48, %v253_v49 }
 0x1d4   :  { %2576 = vtanh.f32 %v339_v50  ;;  %v559_v50 = vld [vmem:[#allocation3 + $0x6] sm:$0x3] }
 0x1de   :  { %v2577_v51 = vpop.eup %2576 }
 0x1df   :  { %348 = vrot.lane.b32.xlu0 %v2577_v51, %s2845_s4  ;;  %v341_v52 = vsub.f32 0.0, %v2577_v51 }
 0x1e1   :  { %343 = vrot.lane.b32.xlu1 %v341_v52, %s2845_s4 }
 0x251   :  { %v349_v55 = vpop.permute.xlu0 %348 }
 0x253   :  { %v344_v53 = vpop.permute.xlu1 %343 }
 0x254   :  { %v346_v54 = vmul.f32 %v2575_v47, %v344_v53 }
 0x256   :  { %v351_v56 = vadd.f32 %v349_v55, %v346_v54 }
 0x258   :  { %353 = vrot.lane.b32.xlu1 %v351_v56, %s2846_s21 }
 0x2ca   :  { %v354_v57 = vpop.permute.xlu1 %353 }
 0x2cb   :  { %357 = vst.msk [vmem:[#allocation4] sm:$0x3] %vm356_vm8, %v354_v57  ;;  %2281 = vmatmul.mubr.msk.f32.vlgmr.msra.gmra.mrb[0].mxu0 %vm148_vm1, %v354_v57 }
 0x2cc   :  { %2473 = vmatpush3.bf16.msra.mxu0 %v2999_v7  ;;  %2302 = vmatprep.mubr.msk.f32.mxu0 %vm2843_vm0, %v2842_v0 }
 0x2cd   :  { %2474 = vmatprep.subr.bf16.mxu0 %v2844_v1 }
 0x2d0   :  { %2476 = vmatpush3.bf16.msra.mxu0 %v3005_v10 }
 0x2d1   :  { %2483 = vmatprep.subr.bf16.mxu0 %v2844_v1 }
 0x39e   :  { %v428_v58 = vpop.f32.mrb[0].mxu0 }
 0x39f   :  { %v429_v59 = vadd.f32 %v3034_v23, %v428_v58  ;;  %v2282_v60 = vpop.f32.mrb[1].mxu0 }
 0x3a1   :  { %440 = vrot.lane.b32.xlu0 %v429_v59, %s2833_s27  ;;  %v432_v62 = vadd.f32 %v429_v59, %v358_v61 }
 0x3a3   :  { %v2127_v63 = vmul.f32 -1.442695, %v432_v62  ;;  %v658_v62 = vld [vmem:[#allocation2 + $0x8] sm:$0x3] }
 0x3a5   :  { %2578 = vpow2.f32 %v2127_v63 }
 0x3af   :  { %v2579_v2 = vpop.eup %2578 }
 0x3b0   :  { %v436_v3 = vadd.f32 1.0, %v2579_v2 }
 0x3b2   :  { %2580 = vrcp.f32 %v436_v3 }
 0x3bc   :  { %v2581_v4 = vpop.eup %2580 }
 0x413   :  { %v441_v5 = vpop.permute.xlu0 %440 }
 0x414   :  { %v443_v6 = vmul.f32 %v2581_v4, %v441_v5 }
 0x416   :  { %v444_v9 = vadd.f32 %v443_v6, %v359_v8 }
 0x418   :  { %2582 = vtanh.f32 %v444_v9 }
 0x422   :  { %v2583_v11 = vpop.eup %2582 }
 0x423   :  { %447 = vrot.lane.b32.xlu1 %v2583_v11, %s2845_s4 }
 0x495   :  { %v448_v12 = vpop.permute.xlu1 %447 }
 0x496   :  { %v450_v13 = vsub.f32 %v351_v56, %v448_v12 }
 0x498   :  { %v451_v14 = vmul.f32 %v2581_v4, %v450_v13 }
 0x49a   :  { %v452_v15 = vadd.f32 %v451_v14, %v448_v12 }
 0x49c   :  { %454 = vrot.lane.b32.xlu0 %v452_v15, %s2846_s21 }
 0x50e   :  { %v455_v17 = vpop.permute.xlu0 %454 }
 0x50f   :  { %457 = vst.msk [vmem:[#allocation4 + $0x2] sm:$0x3] %vm356_vm8, %v455_v17  ;;  %2292 = vmatmul.mubr.msk.f32.vlgmr.msra.gmra.mrb[6].mxu1 %vm148_vm1, %v455_v17 }
 0x510   :  { %2479 = vmatpush3.bf16.msra.mxu1 %v2999_v7  ;;  %2313 = vmatprep.mubr.msk.f32.mxu1 %vm2843_vm0, %v2842_v0 }
 0x511   :  { %2480 = vmatprep.subr.bf16.mxu1 %v2844_v1 }
 0x514   :  { %2482 = vmatpush3.bf16.msra.mxu1 %v3005_v10 }
 0x515   :  { %2489 = vmatprep.subr.bf16.mxu1 %v2844_v1 }
 0x5e2   :  { %v528_v18 = vpop.f32.mrb[6].mxu1 }
 0x5e3   :  { %v529_v19 = vadd.f32 %v3034_v23, %v528_v18  ;;  %v2293_v20 = vpop.f32.mrb[7].mxu1 }
 0x5e5   :  { %540 = vrot.lane.b32.xlu1 %v529_v19, %s2833_s27  ;;  %v532_v22 = vadd.f32 %v529_v19, %v458_v21 }
 0x5e7   :  { %v2129_v24 = vmul.f32 -1.442695, %v532_v22  ;;  %v758_v22 = vld [vmem:[#allocation2 + $0xa] sm:$0x3] }
 0x5e9   :  { %2584 = vpow2.f32 %v2129_v24 }
 0x5f3   :  { %v2585_v25 = vpop.eup %2584 }
 0x5f4   :  { %v536_v27 = vadd.f32 1.0, %v2585_v25 }
 0x5f6   :  { %2586 = vrcp.f32 %v536_v27 }
 0x600   :  { %v2587_v28 = vpop.eup %2586 }
 0x657   :  { %v541_v29 = vpop.permute.xlu1 %540 }
 0x658   :  { %v543_v30 = vmul.f32 %v2587_v28, %v541_v29 }
 0x65a   :  { %v544_v32 = vadd.f32 %v543_v30, %v459_v31 }
 0x65c   :  { %2588 = vtanh.f32 %v544_v32 }
 0x666   :  { %v2589_v33 = vpop.eup %2588 }
 0x667   :  { %547 = vrot.lane.b32.xlu0 %v2589_v33, %s2845_s4 }
 0x6d9   :  { %v548_v34 = vpop.permute.xlu0 %547 }
 0x6da   :  { %v550_v35 = vsub.f32 %v452_v15, %v548_v34 }
 0x6dc   :  { %v551_v36 = vmul.f32 %v2587_v28, %v550_v35 }
 0x6de   :  { %v552_v37 = vadd.f32 %v551_v36, %v548_v34 }
 0x6e0   :  { %554 = vrot.lane.b32.xlu1 %v552_v37, %s2846_s21 }
 0x752   :  { %v555_v38 = vpop.permute.xlu1 %554 }
 0x753   :  { %557 = vst.msk [vmem:[#allocation4 + $0x4] sm:$0x3] %vm356_vm8, %v555_v38  ;;  %2303 = vmatmul.mubr.msk.f32.vlgmr.msra.gmra.mrb[2].mxu0 %vm148_vm1, %v555_v38 }
 0x754   :  { %2485 = vmatpush3.bf16.msra.mxu0 %v2999_v7  ;;  %2324 = vmatprep.mubr.msk.f32.mxu0 %vm2843_vm0, %v2842_v0 }
 0x755   :  { %2486 = vmatprep.subr.bf16.mxu0 %v2844_v1 }
 0x758   :  { %2488 = vmatpush3.bf16.msra.mxu0 %v3005_v10 }
 0x759   :  { %2495 = vmatprep.subr.bf16.mxu0 %v2844_v1 }
 0x826   :  { %v628_v39 = vpop.f32.mrb[2].mxu0 }
 0x827   :  { %v629_v40 = vadd.f32 %v3034_v23, %v628_v39  ;;  %v2304_v41 = vpop.f32.mrb[3].mxu0 }
 0x828   :  { %v858_v41 = vld [vmem:[#allocation2 + $0xc] sm:$0x3] }
 0x829   :  { %640 = vrot.lane.b32.xlu0 %v629_v40, %s2833_s27  ;;  %v632_v43 = vadd.f32 %v629_v40, %v558_v42 }
 0x82b   :  { %v2131_v44 = vmul.f32 -1.442695, %v632_v43 }
 0x82d   :  { %2590 = vpow2.f32 %v2131_v44 }
 0x837   :  { %v2591_v45 = vpop.eup %2590 }
 0x838   :  { %v636_v46 = vadd.f32 1.0, %v2591_v45 }
 0x83a   :  { %2592 = vrcp.f32 %v636_v46 }
 0x844   :  { %v2593_v47 = vpop.eup %2592 }
 0x89b   :  { %v641_v48 = vpop.permute.xlu0 %640 }
 0x89c   :  { %v643_v49 = vmul.f32 %v2593_v47, %v641_v48 }
 0x89e   :  { %v644_v51 = vadd.f32 %v643_v49, %v559_v50 }
 0x8a0   :  { %2594 = vtanh.f32 %v644_v51 }
 0x8aa   :  { %v2595_v52 = vpop.eup %2594 }
 0x8ab   :  { %647 = vrot.lane.b32.xlu1 %v2595_v52, %s2845_s4 }
 0x8af   :  { %225 = vrot.lane.b32.xlu1 %v3025_v16, %s2833_s27 }
 0x91d   :  { %v648_v53 = vpop.permute.xlu1 %647 }
 0x91e   :  { %v650_v54 = vsub.f32 %v552_v37, %v648_v53 }
 0x920   :  { %v651_v55 = vmul.f32 %v2593_v47, %v650_v54 }
 0x921   :  { %v226_v16 = vpop.permute.xlu1 %225 }
 0x922   :  { %v652_v56 = vadd.f32 %v651_v55, %v648_v53 }
 0x924   :  { %654 = vrot.lane.b32.xlu0 %v652_v56, %s2846_s21 }
 0x928   :  { %233 = vrot.lane.b32.xlu0 %v3039_v26, %s2833_s27 }
 0x996   :  { %v655_v57 = vpop.permute.xlu0 %654 }
 0x997   :  { %657 = vst.msk [vmem:[#allocation4 + $0x6] sm:$0x3] %vm356_vm8, %v655_v57  ;;  %2314 = vmatmul.mubr.msk.f32.vlgmr.msra.gmra.mrb[8].mxu1 %vm148_vm1, %v655_v57 }
 0x998   :  { %2491 = vmatpush3.bf16.msra.mxu1 %v2999_v7  ;;  %2335 = vmatprep.mubr.msk.f32.mxu1 %vm2843_vm0, %v2842_v0 }
 0x999   :  { %2492 = vmatprep.subr.bf16.mxu1 %v2844_v1 }
 0x99a   :  { %v234_v58 = vpop.permute.xlu0 %233 }
 0x99b   :  { %v238_v59 = vsel %vm212_vm5, %v226_v16, %v234_v58 }
 0x99c   :  { %240 = vst.msk [vmem:[#allocation3 + $0x8] sm:$0xff] %vm148_vm1, %v238_v59  ;;  %2494 = vmatpush3.bf16.msra.mxu1 %v3005_v10  ;;  %v958_v59 = vld [vmem:[#allocation2 + $0xe] sm:$0x3] }
 0x99d   :  { %2349 = vmatprep.subr.bf16.mxu1 %v2842_v0 }
 0x9a3   :  { %v659_v9 = vld [vmem:[#allocation3 + $0x8] sm:$0x3]  ;;  %v759_v31 = vld [vmem:[#allocation3 + $0xa] sm:$0x3]  ;;  %v859_v49 = vld [vmem:[#allocation3 + $0xc] sm:$0x3] }
 0xa6a   :  { %v728_v26 = vpop.f32.mrb[8].mxu1 }
 0xa6b   :  { %v729_v60 = vadd.f32 %v3034_v23, %v728_v26  ;;  %v2315_v61 = vpop.f32.mrb[9].mxu1 }
 0xa6d   :  { %740 = vrot.lane.b32.xlu1 %v729_v60, %s2833_s27  ;;  %v732_v63 = vadd.f32 %v729_v60, %v658_v62 }
 0xa6f   :  { %v2133_v2 = vmul.f32 -1.442695, %v732_v63 }
 0xa71   :  { %2596 = vpow2.f32 %v2133_v2 }
 0xa7b   :  { %v2597_v3 = vpop.eup %2596 }
 0xa7c   :  { %v736_v4 = vadd.f32 1.0, %v2597_v3 }
 0xa7e   :  { %2598 = vrcp.f32 %v736_v4  ;;  %v959_v4 = vld [vmem:[#allocation3 + $0xe] sm:$0x3] }
 0xa88   :  { %v2599_v5 = vpop.eup %2598 }
 0xadf   :  { %v741_v6 = vpop.permute.xlu1 %740 }
 0xae0   :  { %v743_v8 = vmul.f32 %v2599_v5, %v741_v6 }
 0xae2   :  { %v744_v11 = vadd.f32 %v743_v8, %v659_v9 }
 0xae4   :  { %2600 = vtanh.f32 %v744_v11 }
 0xaee   :  { %v2601_v12 = vpop.eup %2600 }
 0xaef   :  { %747 = vrot.lane.b32.xlu0 %v2601_v12, %s2845_s4  ;;  %v2568_v12 = vld [vmem:[%s3342_s5] sm:$0xff]  }
 0xb61   :  { %v748_v13 = vpop.permute.xlu0 %747 }
 0xb62   :  { %v750_v14 = vsub.f32 %v652_v56, %v748_v13 }
 0xb64   :  { %v751_v15 = vmul.f32 %v2599_v5, %v750_v14  ;;  %v1193_v14 = vld [vmem:[#allocation12 + $0x8] sm:$0xff] }
 0xb66   :  { %v752_v17 = vadd.f32 %v751_v15, %v748_v13  ;;  %v1192_v13 = vld [vmem:[#allocation12] sm:$0xff]  ;;  %v2569_v15 = vld [vmem:[%s3342_s5 + $0x8] sm:$0xff]  }
 0xb68   :  { %754 = vrot.lane.b32.xlu1 %v752_v17, %s2846_s21 }
 0xbda   :  { %v755_v18 = vpop.permute.xlu1 %754 }
 0xbdb   :  { %757 = vst.msk [vmem:[#allocation4 + $0x8] sm:$0x3] %vm356_vm8, %v755_v18  ;;  %2325 = vmatmul.mubr.msk.f32.vlgmr.msra.gmra.mrb[4].mxu0 %vm148_vm1, %v755_v18  ;;  %v1194_v18 = vld [vmem:[#allocation12 + $0x10] sm:$0xff] }
 0xbdc   :  { %2497 = vmatpush3.bf16.msra.mxu0 %v2999_v7  ;;  %2346 = vmatprep.mubr.msk.f32.mxu0 %vm2843_vm0, %v2842_v0 }
 0xbdd   :  { %2498 = vmatprep.subr.bf16.mxu0 %v2844_v1 }
 0xbe0   :  { %2500 = vmatpush3.bf16.msra.mxu0 %v3005_v10 }
 0xbe1   :  { %2501 = vmatprep.subr.bf16.mxu0 %v2844_v1 }
 0xcae   :  { %v828_v19 = vpop.f32.mrb[4].mxu0 }
 0xcaf   :  { %v829_v20 = vadd.f32 %v3034_v23, %v828_v19  ;;  %v2326_v21 = vpop.f32.mrb[5].mxu0  ;;  %v1195_v19 = vld [vmem:[#allocation12 + $0x18] sm:$0xff] }
 0xcb0   :  { %v1058_v21 = vld [vmem:[#allocation4] sm:$0xff] }
 0xcb1   :  { %840 = vrot.lane.b32.xlu0 %v829_v20, %s2833_s27  ;;  %v832_v24 = vadd.f32 %v829_v20, %v758_v22  ;;  %v3157_v20 = vpack.c.bf16 %v1195_v19, %v1194_v18  ;;  %v1066_v22 = vrot.slane %v1058_v21, 6 }
 0xcb3   :  { %v2135_v25 = vmul.f32 -1.442695, %v832_v24  ;;  %v1068_v24 = vrot.slane %v1058_v21, 2 }
 0xcb5   :  { %2602 = vpow2.f32 %v2135_v25 }
 0xcbf   :  { %v2603_v7 = vpop.eup %2602 }
 0xcc0   :  { %v836_v27 = vadd.f32 1.0, %v2603_v7  ;;  %v1073_v7 = vsel %vm203_vm2, %v1066_v22, %v1068_v24 }
 0xcc2   :  { %2604 = vrcp.f32 %v836_v27  ;;  %v1074_v27 = vsel %vm205_vm3, %v1073_v7, %v1066_v22 }
 0xccc   :  { %v2605_v28 = vpop.eup %2604 }
 0xd23   :  { %v841_v29 = vpop.permute.xlu0 %840 }
 0xd24   :  { %v843_v30 = vmul.f32 %v2605_v28, %v841_v29 }
 0xd26   :  { %v844_v10 = vadd.f32 %v843_v30, %v759_v31 }
 0xd28   :  { %2606 = vtanh.f32 %v844_v10 }
 0xd32   :  { %v2607_v32 = vpop.eup %2606 }
 0xd33   :  { %847 = vrot.lane.b32.xlu1 %v2607_v32, %s2845_s4 }
 0xda5   :  { %v848_v33 = vpop.permute.xlu1 %847 }
 0xda6   :  { %v850_v34 = vsub.f32 %v752_v17, %v848_v33  ;;  %v3151_v17 = vpack.c.bf16 %v1193_v14, %v1192_v13 }
 0xda8   :  { %v851_v35 = vmul.f32 %v2605_v28, %v850_v34  ;;  %v1075_v28 = vsel %vm207_vm4, %v1074_v27, %v1068_v24 }
 0xdaa   :  { %v852_v36 = vadd.f32 %v851_v35, %v848_v33 }
 0xdac   :  { %854 = vrot.lane.b32.xlu0 %v852_v36, %s2846_s21 }
 0xe1e   :  { %v855_v37 = vpop.permute.xlu0 %854 }
 0xe1f   :  { %857 = vst.msk [vmem:[#allocation4 + $0xa] sm:$0x3] %vm356_vm8, %v855_v37  ;;  %2336 = vmatmul.mubr.msk.f32.vlgmr.msra.gmra.mrb[10].mxu1 %vm148_vm1, %v855_v37 }
 0xe20   :  { %2353 = vmatprep.mubr.msk.bf16.mxu1 %vm2843_vm0, %v2842_v0  ;;  %2350 = vmatpush3.bf16.msra.mxu1 %v2568_v12 }
 0xe21   :  { %2351 = vmatprep.subr.bf16.mxu1 %v2842_v0 }
 0xe24   :  { %2352 = vmatpush3.bf16.msra.mxu1 %v2569_v15 }
 0xe25   :  { %2507 = vmatprep.subr.bf16.mxu1 %v2844_v1 }
 0xef2   :  { %v928_v38 = vpop.f32.mrb[10].mxu1 }
 0xef3   :  { %v929_v39 = vadd.f32 %v3034_v23, %v928_v38  ;;  %v2337_v40 = vpop.f32.mrb[11].mxu1 }
 0xef5   :  { %940 = vrot.lane.b32.xlu1 %v929_v39, %s2833_s27  ;;  %v932_v42 = vadd.f32 %v929_v39, %v858_v41  ;;  %v2140_v41 = vld [vmem:[#allocation14] ss:$0 sm:$0xff] }
 0xef7   :  { %v2137_v43 = vmul.f32 -1.442695, %v932_v42 }
 0xef9   :  { %2608 = vpow2.f32 %v2137_v43  ;;  %v3186_v43 = vld [vmem:[#allocation15] ss:$0 sm:$0xff] }
 0xf03   :  { %v2609_v44 = vpop.eup %2608 }
 0xf04   :  { %v936_v45 = vadd.f32 1.0, %v2609_v44 }
 0xf06   :  { %2610 = vrcp.f32 %v936_v45 }
 0xf10   :  { %v2611_v46 = vpop.eup %2610 }
 0xf67   :  { %v941_v47 = vpop.permute.xlu1 %940 }
 0xf68   :  { %v943_v48 = vmul.f32 %v2611_v46, %v941_v47 }
 0xf6a   :  { %v944_v50 = vadd.f32 %v943_v48, %v859_v49 }
 0xf6c   :  { %2612 = vtanh.f32 %v944_v50 }
 0xf76   :  { %v2613_v51 = vpop.eup %2612 }
 0xf77   :  { %947 = vrot.lane.b32.xlu0 %v2613_v51, %s2845_s4 }
 0xfe9   :  { %v948_v52 = vpop.permute.xlu0 %947 }
 0xfea   :  { %v950_v53 = vsub.f32 %v852_v36, %v948_v52 }
 0xfec   :  { %v951_v54 = vmul.f32 %v2611_v46, %v950_v53 }
 0xfee   :  { %v952_v55 = vadd.f32 %v951_v54, %v948_v52 }
 0xff0   :  { %954 = vrot.lane.b32.xlu1 %v952_v55, %s2846_s21 }
0x1062   :  { %v955_v56 = vpop.permute.xlu1 %954 }
0x1063   :  { %957 = vst.msk [vmem:[#allocation4 + $0xc] sm:$0x3] %vm356_vm8, %v955_v56  ;;  %2347 = vmatmul.mubr.msk.f32.vlgmr.msra.gmra.mrb[6].mxu0 %vm148_vm1, %v955_v56 }
0x1064   :  { %2365 = vmatprep.mubr.msk.f32.mxu0 %vm2843_vm0, %v2842_v0  ;;  %2503 = vmatpush3.bf16.msra.mxu0 %v3151_v17 }
0x1065   :  { %2504 = vmatprep.subr.bf16.mxu0 %v2844_v1 }
0x1068   :  { %2506 = vmatpush3.bf16.msra.mxu0 %v3157_v20 }
0x1069   :  { %2513 = vmatprep.subr.bf16.mxu0 %v2844_v1 }
0x106b   :  { %2366 = vmatmul.mubr.f32.vlgmr.msra.gmra.mrb[8].mxu0 %v2842_v0 }
0x106c   :  { %2515 = vmatpush3.bf16.msra.mxu0 %v3151_v17  ;;  %2387 = vmatprep.mubr.msk.f32.mxu0 %vm2843_vm0, %v2842_v0 }
0x106d   :  { %2516 = vmatprep.subr.bf16.mxu0 %v2844_v1 }
0x1070   :  { %2518 = vmatpush3.bf16.msra.mxu0 %v3157_v20 }
0x1071   :  { %2525 = vmatprep.subr.bf16.mxu0 %v2844_v1 }
0x1136   :  { %v1028_v57 = vpop.f32.mrb[6].mxu0 }
0x1137   :  { %v1029_v16 = vadd.f32 %v3034_v23, %v1028_v57  ;;  %v2348_v58 = vpop.f32.mrb[7].mxu0 }
0x1139   :  { %1040 = vrot.lane.b32.xlu0 %v1029_v16, %s2833_s27  ;;  %v1032_v26 = vadd.f32 %v1029_v16, %v958_v59 }
0x113b   :  { %v2139_v60 = vmul.f32 -1.442695, %v1032_v26 }
0x113d   :  { %2614 = vpow2.f32 %v2139_v60 }
0x113e   :  { %v1271_v39 = vpop.f32.mrb[8].mxu0 }
0x113f   :  { %v2367_v40 = vpop.f32.mrb[9].mxu0  ;;  %v1272_v49 = vadd.f32 %v3186_v43, %v1271_v39 }
0x1147   :  { %v2615_v61 = vpop.eup %2614 }
0x1148   :  { %v1036_v62 = vadd.f32 1.0, %v2615_v61 }
0x114a   :  { %2616 = vrcp.f32 %v1036_v62 }
0x1154   :  { %v2617_v63 = vpop.eup %2616 }
0x11ab   :  { %v1041_v2 = vpop.permute.xlu0 %1040 }
0x11ac   :  { %v1043_v3 = vmul.f32 %v2617_v63, %v1041_v2 }
0x11ae   :  { %v1044_v5 = vadd.f32 %v1043_v3, %v959_v4 }
0x11b0   :  { %2618 = vtanh.f32 %v1044_v5 }
0x11ba   :  { %v2619_v6 = vpop.eup %2618 }
0x11bb   :  { %1047 = vrot.lane.b32.xlu1 %v2619_v6, %s2845_s4 }
0x122d   :  { %v1048_v23 = vpop.permute.xlu1 %1047 }
0x122e   :  { %v1050_v8 = vsub.f32 %v952_v55, %v1048_v23 }
0x1230   :  { %v1051_v9 = vmul.f32 %v2617_v63, %v1050_v8 }
0x1232   :  { %v1052_v11 = vadd.f32 %v1051_v9, %v1048_v23 }
0x1234   :  { %1054 = vrot.lane.b32.xlu0 %v1052_v11, %s2846_s21 }
0x12a6   :  { %v1055_v25 = vpop.permute.xlu0 %1054 }
0x12a7   :  { %1057 = vst.msk [vmem:[#allocation4 + $0xe] sm:$0x3] %vm356_vm8, %v1055_v25 }
0x12ae   :  { %v1059_v29 = vld [vmem:[#allocation4 + $0x8] sm:$0xff] }
0x12af   :  { %v1061_v30 = vrot.slane %v1059_v29, 6  ;;  %v1063_v31 = vrot.slane %v1059_v29, 2  ;;  %v1077_v10 = vsel %vm212_vm5, %v1059_v29, %v1075_v28 }
0x12b0   :  { %1079 = vst.msk [vmem:[#allocation5 + $0x8] sm:$0xff] %vm148_vm1, %v1077_v10 }
0x12b1   :  { %v1070_v32 = vsel %vm203_vm2, %v1061_v30, %v1063_v31 }
0x12b2   :  { %v1071_v33 = vsel %vm205_vm3, %v1070_v32, %v1061_v30 }
0x12b3   :  { %v1072_v34 = vsel %vm207_vm4, %v1071_v33, %v1063_v31 }
0x12b4   :  { %v1076_v35 = vsel %vm212_vm5, %v1058_v21, %v1072_v34 }
0x12b5   :  { %1078 = vst.msk [vmem:[#allocation5] sm:$0xff] %vm148_vm1, %v1076_v35 }
0x12b7   :  { %v1081_v37 = vld [vmem:[#allocation5 + $0x8] sm:$0xff] }
0x12bc   :  { %v1080_v36 = vld [vmem:[#allocation5] sm:$0xff] }
0x12bd   :  { %v1082_v38 = vpack.c.bf16 %v1081_v37, %v1080_v36 }
0x12bf   :  { %2354 = vmatmul.mubr.msk.bf16.vlgmr.msra.gmra.mrb[12].mxu1 %vm148_vm1, %v1082_v38 }
0x12c0   :  { %2509 = vmatpush3.bf16.msra.mxu1 %v3151_v17  ;;  %2376 = vmatprep.mubr.msk.f32.mxu1 %vm2843_vm0, %v2842_v0 }
0x12c1   :  { %2510 = vmatprep.subr.bf16.mxu1 %v2844_v1 }
0x12c4   :  { %2512 = vmatpush3.bf16.msra.mxu1 %v3157_v20 }
0x12c5   :  { %2519 = vmatprep.subr.bf16.mxu1 %v2844_v1 }
0x1392   :  { %v1143_v42 = vpop.f32.mrb[12].mxu1 }
0x1393   :  { %v1144_v44 = vadd.f32 %v2140_v41, %v1143_v42  ;;  %v2355_v45 = vpop.f32.mrb[13].mxu1 }
0x1394   :  { %v1146_v46 = vpop.f32.mrb[14].mxu1 }
0x1395   :  { %v3188_v47 = vadd.f32 %v2140_v41, %v1146_v46  ;;  %1174 = vrot.lane.b32.xlu1 %v1144_v44, %s2833_s27  ;;  %v2356_v48 = vpop.f32.mrb[15].mxu1  ;;  %v1156_v50 = vrot.slane %v1144_v44, 6  ;;  %v1158_v51 = vrot.slane %v1144_v44, 2 }
0x1397   :  { %v1151_v52 = vrot.slane %v3188_v47, 6  ;;  %v1153_v53 = vrot.slane %v3188_v47, 2  ;;  %v1163_v54 = vsel %vm203_vm2, %v1156_v50, %v1158_v51 }
0x1398   :  { %v1164_v55 = vsel %vm205_vm3, %v1163_v54, %v1156_v50 }
0x1399   :  { %1283 = vrot.lane.b32.xlu1 %v1272_v49, %s2833_s27  ;;  %v1160_v56 = vsel %vm203_vm2, %v1151_v52, %v1153_v53  ;;  %v3199_v57 = vsel %vm207_vm4, %v1164_v55, %v1158_v51 }
0x139a   :  { %v1161_v16 = vsel %vm205_vm3, %v1160_v56, %v1151_v52  ;;  %v1167_v58 = vsel %vm212_vm5, %v3188_v47, %v3199_v57 }
0x139b   :  { %v1162_v59 = vsel %vm207_vm4, %v1161_v16, %v1153_v53  ;;  %v1169_v26 = vsel %vm148_vm1, %v1167_v58, %v3188_v47 }
0x139c   :  { %1182 = vrot.lane.b32.xlu0 %v1162_v59, %s2833_s27  ;;  %v1166_v60 = vsel %vm212_vm5, %v1144_v44, %v1162_v59  ;;  %v1171_v61 = vsel %vm217_vm6, %v1169_v26, %v3199_v57 }
0x139d   :  { %v1168_v62 = vsel %vm148_vm1, %v1166_v60, %v1144_v44  ;;  %1173 = vst.msk [vmem:[#allocation2 + $0x8] sm:$0xff] %vm220_vm7, %v1171_v61 }
0x139e   :  { %v1170_v63 = vsel %vm217_vm6, %v1168_v62, %v1162_v59 }
0x139f   :  { %1172 = vst.msk [vmem:[#allocation2] sm:$0xff] %vm220_vm7, %v1170_v63 }
0x13a6   :  { %v1203_v2 = vld [vmem:[#allocation2] sm:$0x3]  ;;  %v1305_v30 = vld [vmem:[#allocation2 + $0x2] sm:$0x3]  ;;  %v1405_v50 = vld [vmem:[#allocation2 + $0x4] sm:$0x3] }
0x13a7   :  { %v1275_v3 = vadd.f32 %v1272_v49, %v1203_v2 }
0x13a9   :  { %v2145_v4 = vmul.f32 -1.442695, %v1275_v3 }
0x13ab   :  { %2620 = vpow2.f32 %v2145_v4 }
0x13b5   :  { %v2621_v5 = vpop.eup %2620 }
0x13b6   :  { %v1279_v6 = vadd.f32 1.0, %v2621_v5 }
0x13b8   :  { %2622 = vrcp.f32 %v1279_v6  ;;  %v1505_v6 = vld [vmem:[#allocation2 + $0x6] sm:$0x3] }
0x13c2   :  { %v2623_v12 = vpop.eup %2622 }
0x1407   :  { %v1175_v23 = vpop.permute.xlu1 %1174 }
0x140b   :  { %v1284_v11 = vpop.permute.xlu1 %1283 }
0x140c   :  { %v1286_v13 = vmul.f32 %v2623_v12, %v1284_v11 }
0x140e   :  { %v1183_v8 = vpop.permute.xlu0 %1182 }
0x140f   :  { %v1188_v9 = vsel %vm212_vm5, %v1175_v23, %v1183_v8 }
0x1410   :  { %1190 = vst.msk [vmem:[#allocation3] sm:$0xff] %vm148_vm1, %v1188_v9 }
0x1417   :  { %v1204_v14 = vld [vmem:[#allocation3] sm:$0x3]  ;;  %v1306_v37 = vld [vmem:[#allocation3 + $0x2] sm:$0x3]  ;;  %v1406_v58 = vld [vmem:[#allocation3 + $0x4] sm:$0x3] }
0x1418   :  { %v1287_v15 = vadd.f32 %v1286_v13, %v1204_v14 }
0x141a   :  { %2624 = vtanh.f32 %v1287_v15  ;;  %v1506_v15 = vld [vmem:[#allocation3 + $0x6] sm:$0x3] }
0x1424   :  { %v2625_v18 = vpop.eup %2624 }
0x1425   :  { %1296 = vrot.lane.b32.xlu1 %v2625_v18, %s2845_s4  ;;  %v1289_v19 = vsub.f32 0.0, %v2625_v18 }
0x1427   :  { %1291 = vrot.lane.b32.xlu0 %v1289_v19, %s2845_s4 }
0x1497   :  { %v1297_v24 = vpop.permute.xlu1 %1296 }
0x1499   :  { %v1292_v21 = vpop.permute.xlu0 %1291 }
0x149a   :  { %v1294_v22 = vmul.f32 %v2623_v12, %v1292_v21 }
0x149c   :  { %v1299_v25 = vadd.f32 %v1297_v24, %v1294_v22 }
0x149e   :  { %1301 = vrot.lane.b32.xlu0 %v1299_v25, %s2846_s21 }
0x1510   :  { %v1302_v7 = vpop.permute.xlu0 %1301 }
0x1511   :  { %1304 = vst.msk [vmem:[#allocation4] sm:$0x3] %vm356_vm8, %v1302_v7  ;;  %2377 = vmatmul.mubr.msk.f32.vlgmr.msra.gmra.mrb[16].mxu1 %vm148_vm1, %v1302_v7 }
0x1512   :  { %2521 = vmatpush3.bf16.msra.mxu1 %v3151_v17  ;;  %2398 = vmatprep.mubr.msk.f32.mxu1 %vm2843_vm0, %v2842_v0 }
0x1513   :  { %2522 = vmatprep.subr.bf16.mxu1 %v2844_v1 }
0x1516   :  { %2524 = vmatpush3.bf16.msra.mxu1 %v3157_v20 }
0x1517   :  { %2531 = vmatprep.subr.bf16.mxu1 %v2844_v1 }
0x15e4   :  { %v1375_v27 = vpop.f32.mrb[16].mxu1 }
0x15e5   :  { %v1376_v28 = vadd.f32 %v3186_v43, %v1375_v27  ;;  %v2378_v29 = vpop.f32.mrb[17].mxu1 }
0x15e7   :  { %1387 = vrot.lane.b32.xlu1 %v1376_v28, %s2833_s27  ;;  %v1379_v31 = vadd.f32 %v1376_v28, %v1305_v30 }
0x15e9   :  { %v2147_v10 = vmul.f32 -1.442695, %v1379_v31  ;;  %v1605_v31 = vld [vmem:[#allocation2 + $0x8] sm:$0x3] }
0x15eb   :  { %2626 = vpow2.f32 %v2147_v10 }
0x15f5   :  { %v2627_v32 = vpop.eup %2626 }
0x15f6   :  { %v1383_v33 = vadd.f32 1.0, %v2627_v32 }
0x15f8   :  { %2628 = vrcp.f32 %v1383_v33 }
0x1602   :  { %v2629_v34 = vpop.eup %2628 }
0x1659   :  { %v1388_v35 = vpop.permute.xlu1 %1387 }
0x165a   :  { %v1390_v36 = vmul.f32 %v2629_v34, %v1388_v35 }
0x165c   :  { %v1391_v38 = vadd.f32 %v1390_v36, %v1306_v37 }
0x165e   :  { %2630 = vtanh.f32 %v1391_v38 }
0x1668   :  { %v2631_v39 = vpop.eup %2630 }
0x1669   :  { %1394 = vrot.lane.b32.xlu0 %v2631_v39, %s2845_s4 }
0x16db   :  { %v1395_v40 = vpop.permute.xlu0 %1394 }
0x16dc   :  { %v1397_v41 = vsub.f32 %v1299_v25, %v1395_v40 }
0x16de   :  { %v1398_v42 = vmul.f32 %v2629_v34, %v1397_v41 }
0x16e0   :  { %v1399_v44 = vadd.f32 %v1398_v42, %v1395_v40 }
0x16e2   :  { %1401 = vrot.lane.b32.xlu1 %v1399_v44, %s2846_s21 }
0x1754   :  { %v1402_v45 = vpop.permute.xlu1 %1401 }
0x1755   :  { %1404 = vst.msk [vmem:[#allocation4 + $0x2] sm:$0x3] %vm356_vm8, %v1402_v45  ;;  %2388 = vmatmul.mubr.msk.f32.vlgmr.msra.gmra.mrb[10].mxu0 %vm148_vm1, %v1402_v45 }
0x1756   :  { %2527 = vmatpush3.bf16.msra.mxu0 %v3151_v17  ;;  %2409 = vmatprep.mubr.msk.f32.mxu0 %vm2843_vm0, %v2842_v0 }
0x1757   :  { %2528 = vmatprep.subr.bf16.mxu0 %v2844_v1 }
0x175a   :  { %2530 = vmatpush3.bf16.msra.mxu0 %v3157_v20 }
0x175b   :  { %2537 = vmatprep.subr.bf16.mxu0 %v2844_v1 }
0x1828   :  { %v1475_v46 = vpop.f32.mrb[10].mxu0 }
0x1829   :  { %v1476_v48 = vadd.f32 %v3186_v43, %v1475_v46  ;;  %v2389_v49 = vpop.f32.mrb[11].mxu0 }
0x182b   :  { %1487 = vrot.lane.b32.xlu0 %v1476_v48, %s2833_s27  ;;  %v1479_v51 = vadd.f32 %v1476_v48, %v1405_v50 }
0x182d   :  { %v2149_v52 = vmul.f32 -1.442695, %v1479_v51  ;;  %v1705_v51 = vld [vmem:[#allocation2 + $0xa] sm:$0x3] }
0x182f   :  { %2632 = vpow2.f32 %v2149_v52 }
0x1839   :  { %v2633_v53 = vpop.eup %2632 }
0x183a   :  { %v1483_v54 = vadd.f32 1.0, %v2633_v53 }
0x183c   :  { %2634 = vrcp.f32 %v1483_v54 }
0x1846   :  { %v2635_v55 = vpop.eup %2634 }
0x189d   :  { %v1488_v56 = vpop.permute.xlu0 %1487 }
0x189e   :  { %v1490_v16 = vmul.f32 %v2635_v55, %v1488_v56 }
0x18a0   :  { %v1491_v59 = vadd.f32 %v1490_v16, %v1406_v58 }
0x18a2   :  { %2636 = vtanh.f32 %v1491_v59 }
0x18ac   :  { %v2637_v26 = vpop.eup %2636 }
0x18ad   :  { %1494 = vrot.lane.b32.xlu1 %v2637_v26, %s2845_s4 }
0x191f   :  { %v1495_v60 = vpop.permute.xlu1 %1494 }
0x1920   :  { %v1497_v61 = vsub.f32 %v1399_v44, %v1495_v60 }
0x1922   :  { %v1498_v62 = vmul.f32 %v2635_v55, %v1497_v61 }
0x1924   :  { %v1499_v63 = vadd.f32 %v1498_v62, %v1495_v60 }
0x1926   :  { %1501 = vrot.lane.b32.xlu0 %v1499_v63, %s2846_s21 }
0x1998   :  { %v1502_v2 = vpop.permute.xlu0 %1501 }
0x1999   :  { %1504 = vst.msk [vmem:[#allocation4 + $0x4] sm:$0x3] %vm356_vm8, %v1502_v2  ;;  %2399 = vmatmul.mubr.msk.f32.vlgmr.msra.gmra.mrb[18].mxu1 %vm148_vm1, %v1502_v2 }
0x199a   :  { %2533 = vmatpush3.bf16.msra.mxu1 %v3151_v17  ;;  %2420 = vmatprep.mubr.msk.f32.mxu1 %vm2843_vm0, %v2842_v0 }
0x199b   :  { %2534 = vmatprep.subr.bf16.mxu1 %v2844_v1 }
0x199e   :  { %2536 = vmatpush3.bf16.msra.mxu1 %v3157_v20 }
0x199f   :  { %2543 = vmatprep.subr.bf16.mxu1 %v2844_v1 }
0x1a6c   :  { %v1575_v3 = vpop.f32.mrb[18].mxu1 }
0x1a6d   :  { %v1576_v4 = vadd.f32 %v3186_v43, %v1575_v3  ;;  %v2400_v5 = vpop.f32.mrb[19].mxu1 }
0x1a6f   :  { %1587 = vrot.lane.b32.xlu1 %v1576_v4, %s2833_s27  ;;  %v1579_v23 = vadd.f32 %v1576_v4, %v1505_v6  ;;  %v1805_v4 = vld [vmem:[#allocation2 + $0xc] sm:$0x3] }
0x1a71   :  { %v2151_v8 = vmul.f32 -1.442695, %v1579_v23 }
0x1a73   :  { %2638 = vpow2.f32 %v2151_v8 }
0x1a7d   :  { %v2639_v9 = vpop.eup %2638 }
0x1a7e   :  { %v1583_v11 = vadd.f32 1.0, %v2639_v9 }
0x1a80   :  { %2640 = vrcp.f32 %v1583_v11 }
0x1a8a   :  { %v2641_v12 = vpop.eup %2640 }
0x1ae1   :  { %v1588_v13 = vpop.permute.xlu1 %1587 }
0x1ae2   :  { %v1590_v14 = vmul.f32 %v2641_v12, %v1588_v13 }
0x1ae4   :  { %v1591_v18 = vadd.f32 %v1590_v14, %v1506_v15 }
0x1ae6   :  { %2642 = vtanh.f32 %v1591_v18 }
0x1af0   :  { %v2643_v19 = vpop.eup %2642 }
0x1af1   :  { %1594 = vrot.lane.b32.xlu0 %v2643_v19, %s2845_s4 }
0x1af5   :  { %1176 = vrot.lane.b32.xlu0 %v3188_v47, %s2833_s27 }
0x1b63   :  { %v1595_v21 = vpop.permute.xlu0 %1594 }
0x1b64   :  { %v1597_v22 = vsub.f32 %v1499_v63, %v1595_v21 }
0x1b66   :  { %v1598_v24 = vmul.f32 %v2641_v12, %v1597_v22 }
0x1b67   :  { %v1177_v47 = vpop.permute.xlu0 %1176 }
0x1b68   :  { %v1599_v25 = vadd.f32 %v1598_v24, %v1595_v21 }
0x1b6a   :  { %1601 = vrot.lane.b32.xlu1 %v1599_v25, %s2846_s21 }
0x1b6e   :  { %1184 = vrot.lane.b32.xlu1 %v3199_v57, %s2833_s27 }
0x1bdc   :  { %v1602_v7 = vpop.permute.xlu1 %1601 }
0x1bdd   :  { %1604 = vst.msk [vmem:[#allocation4 + $0x6] sm:$0x3] %vm356_vm8, %v1602_v7  ;;  %2410 = vmatmul.mubr.msk.f32.vlgmr.msra.gmra.mrb[12].mxu0 %vm148_vm1, %v1602_v7 }
0x1bde   :  { %2539 = vmatpush3.bf16.msra.mxu0 %v3151_v17  ;;  %2431 = vmatprep.mubr.msk.f32.mxu0 %vm2843_vm0, %v2842_v0 }
0x1bdf   :  { %2540 = vmatprep.subr.bf16.mxu0 %v2844_v1 }
0x1be0   :  { %v1185_v27 = vpop.permute.xlu1 %1184 }
0x1be1   :  { %v1189_v28 = vsel %vm212_vm5, %v1177_v47, %v1185_v27  ;;  %v1905_v27 = vld [vmem:[#allocation2 + $0xe] sm:$0x3] }
0x1be2   :  { %1191 = vst.msk [vmem:[#allocation3 + $0x8] sm:$0xff] %vm148_vm1, %v1189_v28  ;;  %2542 = vmatpush3.bf16.msra.mxu0 %v3157_v20 }
0x1be3   :  { %2445 = vmatprep.subr.bf16.mxu0 %v2842_v0 }
0x1be9   :  { %v1606_v38 = vld [vmem:[#allocation3 + $0x8] sm:$0x3]  ;;  %v1706_v58 = vld [vmem:[#allocation3 + $0xa] sm:$0x3]  ;;  %v1806_v13 = vld [vmem:[#allocation3 + $0xc] sm:$0x3] }
0x1cb0   :  { %v1675_v57 = vpop.f32.mrb[12].mxu0 }
0x1cb1   :  { %v1676_v29 = vadd.f32 %v3186_v43, %v1675_v57  ;;  %v2411_v30 = vpop.f32.mrb[13].mxu0 }
0x1cb3   :  { %1687 = vrot.lane.b32.xlu0 %v1676_v29, %s2833_s27  ;;  %v1679_v10 = vadd.f32 %v1676_v29, %v1605_v31 }
0x1cb5   :  { %v2153_v32 = vmul.f32 -1.442695, %v1679_v10 }
0x1cb7   :  { %2644 = vpow2.f32 %v2153_v32 }
0x1cc1   :  { %v2645_v33 = vpop.eup %2644 }
0x1cc2   :  { %v1683_v34 = vadd.f32 1.0, %v2645_v33  ;;  %v1906_v33 = vld [vmem:[#allocation3 + $0xe] sm:$0x3] }
0x1cc4   :  { %2646 = vrcp.f32 %v1683_v34 }
0x1cce   :  { %v2647_v35 = vpop.eup %2646 }
0x1d25   :  { %v1688_v36 = vpop.permute.xlu0 %1687 }
0x1d26   :  { %v1690_v37 = vmul.f32 %v2647_v35, %v1688_v36 }
0x1d28   :  { %v1691_v39 = vadd.f32 %v1690_v37, %v1606_v38 }
0x1d2a   :  { %2648 = vtanh.f32 %v1691_v39  ;;  %v2570_v39 = vld [vmem:[%s3346_s9] sm:$0xff]  }
0x1d34   :  { %v2649_v40 = vpop.eup %2648 }
0x1d35   :  { %1694 = vrot.lane.b32.xlu1 %v2649_v40, %s2845_s4  ;;  %v2571_v40 = vld [vmem:[%s3346_s9 + $0x8] sm:$0xff]  }
0x1da7   :  { %v1695_v41 = vpop.permute.xlu1 %1694 }
0x1da8   :  { %v1697_v42 = vsub.f32 %v1599_v25, %v1695_v41 }
0x1daa   :  { %v1698_v44 = vmul.f32 %v2647_v35, %v1697_v42 }
0x1dac   :  { %v1699_v45 = vadd.f32 %v1698_v44, %v1695_v41  ;;  %v2005_v41 = vld [vmem:[#allocation4] sm:$0xff] }
0x1dad   :  { %v2013_v42 = vrot.slane %v2005_v41, 6  ;;  %v2015_v44 = vrot.slane %v2005_v41, 2 }
0x1dae   :  { %1701 = vrot.lane.b32.xlu0 %v1699_v45, %s2846_s21 }
0x1e20   :  { %v1702_v46 = vpop.permute.xlu0 %1701 }
0x1e21   :  { %1704 = vst.msk [vmem:[#allocation4 + $0x8] sm:$0x3] %vm356_vm8, %v1702_v46  ;;  %2421 = vmatmul.mubr.msk.f32.vlgmr.msra.gmra.mrb[20].mxu1 %vm148_vm1, %v1702_v46  ;;  %v2020_v46 = vsel %vm203_vm2, %v2013_v42, %v2015_v44 }
0x1e22   :  { %2545 = vmatpush3.bf16.msra.mxu1 %v3151_v17  ;;  %2442 = vmatprep.mubr.msk.f32.mxu1 %vm2843_vm0, %v2842_v0 }
0x1e23   :  { %2546 = vmatprep.subr.bf16.mxu1 %v2844_v1 }
0x1e26   :  { %2548 = vmatpush3.bf16.msra.mxu1 %v3157_v20 }
0x1ef4   :  { %v1775_v48 = vpop.f32.mrb[20].mxu1 }
0x1ef5   :  { %v1776_v49 = vadd.f32 %v3186_v43, %v1775_v48  ;;  %v2422_v50 = vpop.f32.mrb[21].mxu1  ;;  %v2021_v48 = vsel %vm205_vm3, %v2020_v46, %v2013_v42 }
0x1ef7   :  { %1787 = vrot.lane.b32.xlu1 %v1776_v49, %s2833_s27  ;;  %v1779_v52 = vadd.f32 %v1776_v49, %v1705_v51  ;;  %v2022_v49 = vsel %vm207_vm4, %v2021_v48, %v2015_v44 }
0x1ef9   :  { %v2155_v53 = vmul.f32 -1.442695, %v1779_v52 }
0x1efb   :  { %2650 = vpow2.f32 %v2155_v53 }
0x1f05   :  { %v2651_v54 = vpop.eup %2650 }
0x1f06   :  { %v1783_v55 = vadd.f32 1.0, %v2651_v54 }
0x1f08   :  { %2652 = vrcp.f32 %v1783_v55 }
0x1f12   :  { %v2653_v17 = vpop.eup %2652 }
0x1f69   :  { %v1788_v56 = vpop.permute.xlu1 %1787 }
0x1f6a   :  { %v1790_v16 = vmul.f32 %v2653_v17, %v1788_v56 }
0x1f6c   :  { %v1791_v1 = vadd.f32 %v1790_v16, %v1706_v58 }
0x1f6e   :  { %2654 = vtanh.f32 %v1791_v1  ;;  %v2160_v1 = vld [vmem:[%s3347_s10] ss:$0 sm:$0xff] }
0x1f78   :  { %v2655_v20 = vpop.eup %2654 }
0x1f79   :  { %1794 = vrot.lane.b32.xlu0 %v2655_v20, %s2845_s4 }
0x1feb   :  { %v1795_v59 = vpop.permute.xlu0 %1794 }
0x1fec   :  { %v1797_v26 = vsub.f32 %v1699_v45, %v1795_v59 }
0x1fee   :  { %v1798_v60 = vmul.f32 %v2653_v17, %v1797_v26 }
0x1ff0   :  { %v1799_v61 = vadd.f32 %v1798_v60, %v1795_v59 }
0x1ff2   :  { %1801 = vrot.lane.b32.xlu1 %v1799_v61, %s2846_s21 }
0x2064   :  { %v1802_v62 = vpop.permute.xlu1 %1801 }
0x2065   :  { %1804 = vst.msk [vmem:[#allocation4 + $0xa] sm:$0x3] %vm356_vm8, %v1802_v62  ;;  %2432 = vmatmul.mubr.msk.f32.vlgmr.msra.gmra.mrb[14].mxu0 %vm148_vm1, %v1802_v62 }
0x2066   :  { %2449 = vmatprep.mubr.msk.bf16.mxu0 %vm2843_vm0, %v2842_v0  ;;  %2446 = vmatpush3.bf16.msra.mxu0 %v2570_v39 }
0x2067   :  { %2447 = vmatprep.subr.bf16.mxu0 %v2842_v0 }
0x206a   :  { %2448 = vmatpush3.bf16.msra.mxu0 %v2571_v40 }
0x2138   :  { %v1875_v63 = vpop.f32.mrb[14].mxu0 }
0x2139   :  { %v1876_v2 = vadd.f32 %v3186_v43, %v1875_v63  ;;  %v2433_v3 = vpop.f32.mrb[15].mxu0 }
0x213b   :  { %1887 = vrot.lane.b32.xlu0 %v1876_v2, %s2833_s27  ;;  %v1879_v5 = vadd.f32 %v1876_v2, %v1805_v4 }
0x213d   :  { %v2157_v6 = vmul.f32 -1.442695, %v1879_v5 }
0x213f   :  { %2656 = vpow2.f32 %v2157_v6 }
0x2149   :  { %v2657_v23 = vpop.eup %2656 }
0x214a   :  { %v1883_v8 = vadd.f32 1.0, %v2657_v23 }
0x214c   :  { %2658 = vrcp.f32 %v1883_v8 }
0x2156   :  { %v2659_v9 = vpop.eup %2658 }
0x21ad   :  { %v1888_v11 = vpop.permute.xlu0 %1887 }
0x21ae   :  { %v1890_v12 = vmul.f32 %v2659_v9, %v1888_v11 }
0x21b0   :  { %v1891_v14 = vadd.f32 %v1890_v12, %v1806_v13 }
0x21b2   :  { %2660 = vtanh.f32 %v1891_v14 }
0x21bc   :  { %v2661_v15 = vpop.eup %2660 }
0x21bd   :  { %1894 = vrot.lane.b32.xlu1 %v2661_v15, %s2845_s4 }
0x222f   :  { %v1895_v18 = vpop.permute.xlu1 %1894 }
0x2230   :  { %v1897_v19 = vsub.f32 %v1799_v61, %v1895_v18 }
0x2232   :  { %v1898_v21 = vmul.f32 %v2659_v9, %v1897_v19 }
0x2234   :  { %v1899_v22 = vadd.f32 %v1898_v21, %v1895_v18 }
0x2236   :  { %1901 = vrot.lane.b32.xlu0 %v1899_v22, %s2846_s21 }
0x22a8   :  { %v1902_v24 = vpop.permute.xlu0 %1901 }
0x22a9   :  { %1904 = vst.msk [vmem:[#allocation4 + $0xc] sm:$0x3] %vm356_vm8, %v1902_v24  ;;  %2443 = vmatmul.mubr.msk.f32.vlgmr.msra.gmra.mrb[22].mxu1 %vm148_vm1, %v1902_v24 }
0x237c   :  { %v1975_v25 = vpop.f32.mrb[22].mxu1 }
0x237d   :  { %v1976_v7 = vadd.f32 %v3186_v43, %v1975_v25  ;;  %v2444_v47 = vpop.f32.mrb[23].mxu1 }
0x237f   :  { %1987 = vrot.lane.b32.xlu1 %v1976_v7, %s2833_s27  ;;  %v1979_v28 = vadd.f32 %v1976_v7, %v1905_v27 }
0x2381   :  { %v2159_v57 = vmul.f32 -1.442695, %v1979_v28 }
0x2383   :  { %2662 = vpow2.f32 %v2159_v57 }
0x238d   :  { %v2663_v29 = vpop.eup %2662 }
0x238e   :  { %v1983_v30 = vadd.f32 1.0, %v2663_v29 }
0x2390   :  { %2664 = vrcp.f32 %v1983_v30 }
0x239a   :  { %v2665_v31 = vpop.eup %2664 }
0x23f1   :  { %v1988_v10 = vpop.permute.xlu1 %1987 }
0x23f2   :  { %v1990_v32 = vmul.f32 %v2665_v31, %v1988_v10 }
0x23f4   :  { %v1991_v34 = vadd.f32 %v1990_v32, %v1906_v33 }
0x23f6   :  { %2666 = vtanh.f32 %v1991_v34 }
0x2400   :  { %v2667_v35 = vpop.eup %2666 }
0x2401   :  { %1994 = vrot.lane.b32.xlu0 %v2667_v35, %s2845_s4 }
0x2473   :  { %v1995_v43 = vpop.permute.xlu0 %1994 }
0x2474   :  { %v1997_v36 = vsub.f32 %v1899_v22, %v1995_v43 }
0x2476   :  { %v1998_v37 = vmul.f32 %v2665_v31, %v1997_v36 }
0x2478   :  { %v1999_v38 = vadd.f32 %v1998_v37, %v1995_v43 }
0x247a   :  { %2001 = vrot.lane.b32.xlu1 %v1999_v38, %s2846_s21 }
0x24ec   :  { %v2002_v45 = vpop.permute.xlu1 %2001 }
0x24ed   :  { %2004 = vst.msk [vmem:[#allocation4 + $0xe] sm:$0x3] %vm356_vm8, %v2002_v45 }
0x24f4   :  { %v2006_v50 = vld [vmem:[#allocation4 + $0x8] sm:$0xff] }
0x24f5   :  { %v2008_v51 = vrot.slane %v2006_v50, 6  ;;  %v2010_v52 = vrot.slane %v2006_v50, 2  ;;  %v2024_v53 = vsel %vm212_vm5, %v2006_v50, %v2022_v49 }
0x24f6   :  { %2026 = vst.msk [vmem:[#allocation5 + $0x8] sm:$0xff] %vm148_vm1, %v2024_v53 }
0x24f7   :  { %v2017_v0 = vsel %vm203_vm2, %v2008_v51, %v2010_v52 }
0x24f8   :  { %v2018_v54 = vsel %vm205_vm3, %v2017_v0, %v2008_v51 }
0x24f9   :  { %v2019_v55 = vsel %vm207_vm4, %v2018_v54, %v2010_v52 }
0x24fa   :  { %v2023_v17 = vsel %vm212_vm5, %v2005_v41, %v2019_v55 }
0x24fb   :  { %2025 = vst.msk [vmem:[#allocation5] sm:$0xff] %vm148_vm1, %v2023_v17 }
0x24fd   :  { %v2028_v16 = vld [vmem:[#allocation5 + $0x8] sm:$0xff] }
0x2502   :  { %v2027_v56 = vld [vmem:[#allocation5] sm:$0xff] }
0x2503   :  { %v2029_v58 = vpack.c.bf16 %v2028_v16, %v2027_v56 }
0x2505   :  { %2450 = vmatmul.mubr.msk.bf16.vlgmr.msra.gmra.mrb[16].mxu0 %vm148_vm1, %v2029_v58 }
0x25d8   :  { %v2090_v20 = vpop.f32.mrb[16].mxu0 }
0x25d9   :  { %v2091_v59 = vadd.f32 %v2160_v1, %v2090_v20  ;;  %v2451_v26 = vpop.f32.mrb[17].mxu0 }
0x25da   :  { %v2093_v60 = vpop.f32.mrb[18].mxu0 }
0x25db   :  { %2097 = vst [vmem:[#allocation17] sm:$0xff] %v2091_v59  ;;  %v2094_v61 = vadd.f32 %v2160_v1, %v2093_v60  ;;  %v2452_v62 = vpop.f32.mrb[19].mxu0 }
0x25dd   :  { %2098 = vst [vmem:[#allocation17 + $0x8] sm:$0xff] %v2094_v61 }
0x25de   :  { %2811 = shalt.err (!%p2808_p10)
}
0x25df   :  { %s2812_s28 = scalar_lea.hbm %s3348_s11, 256 }
0x25e0   :  { %p2813_p11 = scmp.ne.s32.totalorder %s3348_s11, %s2812_s28  ;;  %p2816_p12 = scmp.lt.u32.totalorder %s2812_s28, %s3348_s11 }
0x25e2   :  { %p2818_p13 = pnand %p2816_p12, %p2813_p11 }
0x25e4   :  { %2821 = shalt.err (!%p2818_p13)
}
0x25e5   :  { %2110 = dma.vmem_to_hbm [thread:$0]  %s2105_s14, 256, %s3348_s11, [#allocation8], %s2837_s18, %s2837_s18, %s2838_s24  }
0x25e6   :  { %2830 = dma.done.wait [#allocation8], 256  }
0x25e7   :  { %2831 = vsyncadd [#allocation8], 4294967040 }
0x25e8   :  { %2114 = vsyncpa [#allocation7], 1 }
0x25e9   :  { %2115 = vsyncpa [#allocation10], 1 }
0x25ea   :  { %2116 = vsyncpa [#allocation13], 1 }
0x25eb   :  { %2117 = vsyncpa [#allocation16], 1 }
0x25ec   :  { %2118 = vsyncpa [#allocation8], 1 }

</bundles_post_ra>
